<compile_context>
chip_gen: v6e
topology: v6e:2x2x1
jax: 0.10.0
libtpu: 0.0.40
codegen_flags: <defaults>
</compile_context>

<pallas_src>
import functools
import math

import jax
import jax.numpy as jnp
from jax.experimental import pallas as pl
from jax.experimental.pallas import tpu as pltpu


def _round_up(x, m):
    return (x + m - 1) // m * m


# ----------------------------------------------------------------------------
# Kernel: one batch tile of the full 3-layer MLP (weights VMEM-resident)
# ----------------------------------------------------------------------------
def critic_kernel(x_ref,
                  w1_ref, b1_ref,
                  w2h_ref, w2a_ref, b2_ref,
                  w3_ref, b3_ref,
                  out_ref):
    x = x_ref[...]                                   # [TM, in_p] bf16, fused [obs|act]

    # fc1 + relu: only the obs rows of w1 are nonzero -> x @ w1 == obs @ W1.
    h1 = jnp.dot(x, w1_ref[...], preferred_element_type=jnp.float32)
    h1 = jnp.maximum(h1 + b1_ref[...], 0.0).astype(jnp.bfloat16)

    # fc2 on concat([h1, action]) == h1 @ W2h + action @ W2a, + b2, relu.
    # Only the action rows of w2a are nonzero -> x @ w2a == action @ W2a.
    h2 = jnp.dot(h1, w2h_ref[...], preferred_element_type=jnp.float32)
    h2 = h2 + jnp.dot(x, w2a_ref[...], preferred_element_type=jnp.float32)
    h2 = jnp.maximum(h2 + b2_ref[...], 0.0).astype(jnp.bfloat16)

    # fc3 (no activation).  Store a transposed, lane-dense output slab:
    # batch on the lane axis, (padded) output features on sublanes.
    q = jnp.dot(h2, w3_ref[...], preferred_element_type=jnp.float32)
    q = q + b3_ref[...]                              # [TM, out_cols] f32
    qt = q.T                                         # [out_cols, TM] (XLU transpose)
    out_ref[...] = qt[:out_ref.shape[0], :].astype(out_ref.dtype)


# ----------------------------------------------------------------------------
# One-time parameter preparation (padding + bf16 cast), OUT of the hot path
# ----------------------------------------------------------------------------
def prepare_critic_params(params):
    """Pad weights to TPU-friendly shapes, lay them out against the fused
    [obs | action] input, and cast matmul operands to bf16."""
    w1, b1, w2, b2, w3, b3 = (params[k] for k in
                              ("w1", "b1", "w2", "b2", "w3", "b3"))
    obs_dim, h0 = w1.shape
    h0a, h1 = w2.shape
    act_dim = h0a - h0
    _, out_dim = w3.shape

    in_p = _round_up(obs_dim + act_dim, 128)
    h0_p = _round_up(h0, 128)
    h1_p = _round_up(h1, 128)
    out_cols = _round_up(out_dim, 128)

    bf16 = jnp.bfloat16

    def pad2(a, top, rows_to, cols_to, dtype):
        a = jnp.asarray(a, dtype)
        return jnp.pad(a, ((top, rows_to - top - a.shape[0]),
                           (0, cols_to - a.shape[1])))

    def pad_row(a, c):
        a = jnp.asarray(a, jnp.float32).reshape(1, -1)
        return jnp.pad(a, ((0, 0), (0, c - a.shape[1])))

    padded = {
        # fc1 weight: obs rows at [0:obs_dim], zeros over the action/pad rows.
        "w1":  pad2(w1, 0, in_p, h0_p, bf16),
        "b1":  pad_row(b1, h0_p),
        # fc2 hidden part.
        "w2h": pad2(w2[:h0, :], 0, h0_p, h1_p, bf16),
        # fc2 action part, placed at rows [obs_dim : obs_dim+act_dim].
        "w2a": pad2(w2[h0:, :], obs_dim, in_p, h1_p, bf16),
        "b2":  pad_row(b2, h1_p),
        "w3":  pad2(w3, 0, h1_p, out_cols, bf16),
        "b3":  pad_row(b3, out_cols),
    }
    return jax.tree_util.tree_map(jax.device_put, padded)


# ----------------------------------------------------------------------------
# Forward (hot path)
# ----------------------------------------------------------------------------
@functools.partial(jax.jit, static_argnames=("output_dim",))
def critic_forward(obs, action, padded, *, output_dim):
    B, obs_dim = obs.shape
    _, act_dim = action.shape
    in_dim = obs_dim + act_dim

    in_p = padded["w1"].shape[0]
    out_rows = _round_up(output_dim, 8)     # sublane rows of transposed output

    # Batch tiling.  TM is always a multiple of 128 (it sits on the lane axis
    # of the transposed output).  For B > 128 emit an even number (>= 2) of
    # tiles so both v7x TensorCores are used; cap TM at 512 (plenty to
    # amortize step overhead, tiny vs. VMEM on v5e/v6e/v7x).
    if B <= 128:
        TM = 128
        Bp = 128
    else:
        TM = min(512, _round_up((B + 1) // 2, 128))
        Bp = _round_up(B, 2 * TM)

    # Single fused activation stream: one pad of (obs_dim+act_dim) -> 128 lanes.
    x = jnp.concatenate([obs, action], axis=1).astype(jnp.bfloat16)
    x = jnp.pad(x, ((0, Bp - B), (0, in_p - in_dim)))

    def resident(shape):
        # Same block every grid step -> stays in VMEM, no re-DMA.
        return pl.BlockSpec(shape, lambda i: (0,) * len(shape))

    out_pad = pl.pallas_call(
        critic_kernel,
        out_shape=jax.ShapeDtypeStruct((out_rows, Bp), jnp.float32),
        grid_spec=pl.GridSpec(
            grid=(Bp // TM,),
            in_specs=[
                pl.BlockSpec((TM, in_p), lambda i: (i, 0)),   # fused obs|act tile
                resident(padded["w1"].shape),
                resident(padded["b1"].shape),
                resident(padded["w2h"].shape),
                resident(padded["w2a"].shape),
                resident(padded["b2"].shape),
                resident(padded["w3"].shape),
                resident(padded["b3"].shape),
            ],
            out_specs=pl.BlockSpec((out_rows, TM), lambda i: (0, i)),
        ),
        compiler_params=pltpu.CompilerParams(
            dimension_semantics=("parallel",),   # megacore batch sharding (v7x)
            vmem_limit_bytes=32 * 1024 * 1024,
        ),
    )(x,
      padded["w1"], padded["b1"],
      padded["w2h"], padded["w2a"], padded["b2"],
      padded["w3"], padded["b3"])

    # [out_rows, Bp] -> [B, output_dim]
    return out_pad[:output_dim, :B].T


# ----------------------------------------------------------------------------
# Parameter init mirroring the PyTorch module's scheme
# ----------------------------------------------------------------------------
def init_critic_params(key, action_dim, obs_dim, output_dim,
                       hidden0=400, hidden1=300):
    """fanin_init uses v = 1/sqrt(weight.size(0)) = 1/sqrt(out_features);
    biases keep PyTorch's default U(-1/sqrt(in_features), 1/sqrt(in_features)).
    Weights stored as [in, out] (transposed vs. PyTorch)."""
    ks = jax.random.split(key, 6)
    f32 = jnp.float32

    def u(k, shape, bound):
        return jax.random.uniform(k, shape, f32, minval=-bound, maxval=bound)

    v1 = 1.0 / math.sqrt(hidden0)            # fanin_init on fc1.weight
    v2 = 1.0 / math.sqrt(hidden1)            # fanin_init on fc2.weight
    params = {
        "w1": u(ks[0], (obs_dim, hidden0), v1),
        "b1": u(ks[1], (hidden0,), 1.0 / math.sqrt(obs_dim)),
        "w2": u(ks[2], (hidden0 + action_dim, hidden1), v2),
        "b2": u(ks[3], (hidden1,), 1.0 / math.sqrt(hidden0 + action_dim)),
        "w3": u(ks[4], (hidden1, output_dim), 0.003),
        "b3": u(ks[5], (output_dim,), 1.0 / math.sqrt(hidden1)),
    }
    return params


def critic_reference(obs, action, params):
    """Pure-JAX f32 reference for correctness check."""
    h1 = jnp.maximum(obs @ params["w1"] + params["b1"], 0.0)
    h1a = jnp.concatenate([h1, action], axis=1)
    h2 = jnp.maximum(h1a @ params["w2"] + params["b2"], 0.0)
    return h2 @ params["w3"] + params["b3"]


if __name__ == "__main__":
    key = jax.random.PRNGKey(0)
    k_obs, k_act, k_params = jax.random.split(key, 3)

    batch, obs_dim, action_dim, output_dim = 2, 16, 4, 1

    obs = jax.random.normal(k_obs, (batch, obs_dim), jnp.float32)
    action = jax.random.normal(k_act, (batch, action_dim), jnp.float32)
    params = init_critic_params(k_params, action_dim, obs_dim, output_dim)

    padded = prepare_critic_params(params)          # one-time, off hot path

    q = critic_forward(obs, action, padded, output_dim=output_dim)
    q = jax.block_until_ready(q)

    q_ref = critic_reference(obs, action, params)
    assert q.shape == (batch, output_dim)
    # bf16 matmul operands -> relaxed tolerance vs. the f32 reference.
    assert jnp.allclose(q, q_ref, atol=2e-2, rtol=2e-2), (q, q_ref)

    # Also exercise the multi-tile (even-grid) path with a larger batch.
    big_B = 600
    k_o2, k_a2 = jax.random.split(jax.random.PRNGKey(1))
    obs2 = jax.random.normal(k_o2, (big_B, obs_dim), jnp.float32)
    act2 = jax.random.normal(k_a2, (big_B, action_dim), jnp.float32)
    q2 = jax.block_until_ready(
        critic_forward(obs2, act2, padded, output_dim=output_dim))
    q2_ref = critic_reference(obs2, act2, params)
    assert q2.shape == (big_B, output_dim)
    assert jnp.allclose(q2, q2_ref, atol=2e-2, rtol=2e-2)

    print("KERNEL_OK")
</pallas_src>

<mosaic_0001>
module attributes {stable_mosaic.version = 11 : i64} {
  func.func @critic_kernel(%arg0: i32, %arg1: memref<128x128xbf16, #tpu.memory_space<vmem>>, %arg2: memref<128x512xbf16, #tpu.memory_space<vmem>>, %arg3: memref<1x512xf32, #tpu.memory_space<vmem>>, %arg4: memref<512x384xbf16, #tpu.memory_space<vmem>>, %arg5: memref<128x384xbf16, #tpu.memory_space<vmem>>, %arg6: memref<1x384xf32, #tpu.memory_space<vmem>>, %arg7: memref<384x128xbf16, #tpu.memory_space<vmem>>, %arg8: memref<1x128xf32, #tpu.memory_space<vmem>>, %arg9: memref<8x128xf32, #tpu.memory_space<vmem>>) attributes {dimension_semantics = [#tpu.dimension_semantics<parallel>], iteration_bounds = array<i64: 1>, scalar_prefetch = 0 : i64, scratch_operands = 0 : i64, tpu.core_type = #tpu.core_type<tc>, window_params = [{transform_indices = @transform_0, window_bounds = array<i64: 128, 128>}, {pipeline_mode = #tpu.pipeline_mode<synchronous>, transform_indices = @transform_1, window_bounds = array<i64: 128, 512>}, {pipeline_mode = #tpu.pipeline_mode<synchronous>, transform_indices = @transform_2, window_bounds = array<i64: 1, 512>}, {pipeline_mode = #tpu.pipeline_mode<synchronous>, transform_indices = @transform_3, window_bounds = array<i64: 512, 384>}, {pipeline_mode = #tpu.pipeline_mode<synchronous>, transform_indices = @transform_4, window_bounds = array<i64: 128, 384>}, {pipeline_mode = #tpu.pipeline_mode<synchronous>, transform_indices = @transform_5, window_bounds = array<i64: 1, 384>}, {pipeline_mode = #tpu.pipeline_mode<synchronous>, transform_indices = @transform_6, window_bounds = array<i64: 384, 128>}, {pipeline_mode = #tpu.pipeline_mode<synchronous>, transform_indices = @transform_7, window_bounds = array<i64: 1, 128>}, {transform_indices = @transform_8, window_bounds = array<i64: 8, 128>}]} {
    %c0 = arith.constant 0 : index
    %c0_0 = arith.constant 0 : index
    %0 = vector.load %arg1[%c0, %c0_0] : memref<128x128xbf16, #tpu.memory_space<vmem>>, vector<128x128xbf16>
    %c0_1 = arith.constant 0 : index
    %c0_2 = arith.constant 0 : index
    %1 = vector.load %arg2[%c0_1, %c0_2] : memref<128x512xbf16, #tpu.memory_space<vmem>>, vector<128x512xbf16>
    %cst = arith.constant dense<0.000000e+00> : vector<128x512xf32>
    %2 = tpu.matmul %0, %1, %cst {dimension_numbers = #tpu.dot_dimension_numbers<[1], [0], [0], [1], [0, 0, 1, 1], [], []>} : vector<128x128xbf16>, vector<128x512xbf16>, vector<128x512xf32> -> vector<128x512xf32>
    %c0_3 = arith.constant 0 : index
    %c0_4 = arith.constant 0 : index
    %3 = vector.load %arg3[%c0_3, %c0_4] : memref<1x512xf32, #tpu.memory_space<vmem>>, vector<1x512xf32>
    %4 = vector.broadcast %3 : vector<1x512xf32> to vector<128x512xf32>
    %5 = arith.addf %2, %4 : vector<128x512xf32>
    %cst_5 = arith.constant 0.000000e+00 : f32
    %6 = vector.broadcast %cst_5 : f32 to vector<128x512xf32>
    %7 = arith.maximumf %5, %6 : vector<128x512xf32>
    %8 = arith.truncf %7 : vector<128x512xf32> to vector<128x512xbf16>
    %c0_6 = arith.constant 0 : index
    %c0_7 = arith.constant 0 : index
    %9 = vector.load %arg4[%c0_6, %c0_7] : memref<512x384xbf16, #tpu.memory_space<vmem>>, vector<512x384xbf16>
    %cst_8 = arith.constant dense<0.000000e+00> : vector<128x384xf32>
    %10 = tpu.matmul %8, %9, %cst_8 {dimension_numbers = #tpu.dot_dimension_numbers<[1], [0], [0], [1], [0, 0, 1, 1], [], []>} : vector<128x512xbf16>, vector<512x384xbf16>, vector<128x384xf32> -> vector<128x384xf32>
    %c0_9 = arith.constant 0 : index
    %c0_10 = arith.constant 0 : index
    %11 = vector.load %arg5[%c0_9, %c0_10] : memref<128x384xbf16, #tpu.memory_space<vmem>>, vector<128x384xbf16>
    %cst_11 = arith.constant dense<0.000000e+00> : vector<128x384xf32>
    %12 = tpu.matmul %0, %11, %cst_11 {dimension_numbers = #tpu.dot_dimension_numbers<[1], [0], [0], [1], [0, 0, 1, 1], [], []>} : vector<128x128xbf16>, vector<128x384xbf16>, vector<128x384xf32> -> vector<128x384xf32>
    %13 = arith.addf %10, %12 : vector<128x384xf32>
    %c0_12 = arith.constant 0 : index
    %c0_13 = arith.constant 0 : index
    %14 = vector.load %arg6[%c0_12, %c0_13] : memref<1x384xf32, #tpu.memory_space<vmem>>, vector<1x384xf32>
    %15 = vector.broadcast %14 : vector<1x384xf32> to vector<128x384xf32>
    %16 = arith.addf %13, %15 : vector<128x384xf32>
    %cst_14 = arith.constant 0.000000e+00 : f32
    %17 = vector.broadcast %cst_14 : f32 to vector<128x384xf32>
    %18 = arith.maximumf %16, %17 : vector<128x384xf32>
    %19 = arith.truncf %18 : vector<128x384xf32> to vector<128x384xbf16>
    %c0_15 = arith.constant 0 : index
    %c0_16 = arith.constant 0 : index
    %20 = vector.load %arg7[%c0_15, %c0_16] : memref<384x128xbf16, #tpu.memory_space<vmem>>, vector<384x128xbf16>
    %cst_17 = arith.constant dense<0.000000e+00> : vector<128x128xf32>
    %21 = tpu.matmul %19, %20, %cst_17 {dimension_numbers = #tpu.dot_dimension_numbers<[1], [0], [0], [1], [0, 0, 1, 1], [], []>} : vector<128x384xbf16>, vector<384x128xbf16>, vector<128x128xf32> -> vector<128x128xf32>
    %c0_18 = arith.constant 0 : index
    %c0_19 = arith.constant 0 : index
    %22 = vector.load %arg8[%c0_18, %c0_19] : memref<1x128xf32, #tpu.memory_space<vmem>>, vector<1x128xf32>
    %23 = vector.broadcast %22 : vector<1x128xf32> to vector<128x128xf32>
    %24 = arith.addf %21, %23 : vector<128x128xf32>
    %25 = tpu.transpose %24, [1, 0] : vector<128x128xf32> -> vector<128x128xf32>
    %26 = vector.extract_strided_slice %25 {offsets = [0, 0], sizes = [8, 128], strides = [1, 1]} : vector<128x128xf32> to vector<8x128xf32>
    %c0_20 = arith.constant 0 : index
    %c0_21 = arith.constant 0 : index
    %27 = vector.load %arg9[%c0_20, %c0_21] : memref<8x128xf32, #tpu.memory_space<vmem>>, vector<8x128xf32>
    tpu.vector_store %arg9[%c0_20, %c0_21], %26 {strides = array<i32>} : memref<8x128xf32, #tpu.memory_space<vmem>>, vector<8x128xf32>,
    return
  }
  func.func @transform_0(%arg0: i32) -> (i32, i32) {
    %c0_i32 = arith.constant 0 : i32
    %c0_i32_0 = arith.constant 0 : i32
    return %arg0, %c0_i32 : i32, i32
  }
  func.func @transform_1(%arg0: i32) -> (i32, i32) {
    %c0_i32 = arith.constant 0 : i32
    %c0_i32_0 = arith.constant 0 : i32
    %c0_i32_1 = arith.constant 0 : i32
    return %c0_i32, %c0_i32_0 : i32, i32
  }
  func.func @transform_2(%arg0: i32) -> (i32, i32) {
    %c0_i32 = arith.constant 0 : i32
    %c0_i32_0 = arith.constant 0 : i32
    %c0_i32_1 = arith.constant 0 : i32
    return %c0_i32, %c0_i32_0 : i32, i32
  }
  func.func @transform_3(%arg0: i32) -> (i32, i32) {
    %c0_i32 = arith.constant 0 : i32
    %c0_i32_0 = arith.constant 0 : i32
    %c0_i32_1 = arith.constant 0 : i32
    return %c0_i32, %c0_i32_0 : i32, i32
  }
  func.func @transform_4(%arg0: i32) -> (i32, i32) {
    %c0_i32 = arith.constant 0 : i32
    %c0_i32_0 = arith.constant 0 : i32
    %c0_i32_1 = arith.constant 0 : i32
    return %c0_i32, %c0_i32_0 : i32, i32
  }
  func.func @transform_5(%arg0: i32) -> (i32, i32) {
    %c0_i32 = arith.constant 0 : i32
    %c0_i32_0 = arith.constant 0 : i32
    %c0_i32_1 = arith.constant 0 : i32
    return %c0_i32, %c0_i32_0 : i32, i32
  }
  func.func @transform_6(%arg0: i32) -> (i32, i32) {
    %c0_i32 = arith.constant 0 : i32
    %c0_i32_0 = arith.constant 0 : i32
    %c0_i32_1 = arith.constant 0 : i32
    return %c0_i32, %c0_i32_0 : i32, i32
  }
  func.func @transform_7(%arg0: i32) -> (i32, i32) {
    %c0_i32 = arith.constant 0 : i32
    %c0_i32_0 = arith.constant 0 : i32
    %c0_i32_1 = arith.constant 0 : i32
    return %c0_i32, %c0_i32_0 : i32, i32
  }
  func.func @transform_8(%arg0: i32) -> (i32, i32) {
    %c0_i32 = arith.constant 0 : i32
    %c0_i32_0 = arith.constant 0 : i32
    return %c0_i32, %arg0 : i32, i32
  }
}

</mosaic_0001>

<bundles_post_ra>
// kernel: critic_forward.1
= control target key start
LH: loop header
LB: loop body
LE: loop exit
PB: predicated region body
PF: predicated region fallthrough
CT: control target
= control target key end

     0   :  { %13 = vsyncpa [#allocation3], 0  ;;  %s4116_s0 = inlined_call_operand.vmem [shape: bf16[128,128], index: 0, kind: input, shape index: {}]   ;;  %s4117_s1 = inlined_call_operand.hbm [shape: bf16[128,512], index: 1, kind: input, shape index: {}]   ;;  %s4118_s2 = inlined_call_operand.vmem [shape: f32[1,512], index: 2, kind: input, shape index: {}]   ;;  %s4119_s3 = inlined_call_operand.hbm [shape: bf16[512,384], index: 3, kind: input, shape index: {}]   ;;  %s4120_s4 = inlined_call_operand.hbm [shape: bf16[128,384], index: 4, kind: input, shape index: {}]   ;;  %s4121_s5 = inlined_call_operand.vmem [shape: f32[1,384], index: 5, kind: input, shape index: {}]   ;;  %s4122_s6 = inlined_call_operand.hbm [shape: bf16[384,128], index: 6, kind: input, shape index: {}]   ;;  %s4123_s7 = inlined_call_operand.vmem [shape: f32[1,128], index: 7, kind: input, shape index: {}]   ;;  %s4124_s8 = inlined_call_operand.vmem [shape: f32[8,128], index: 8, kind: output, shape index: {}]  }
   0x1   :  { %14 = vsyncpa [#allocation5], 0 }
   0x2   :  { %15 = vsyncpa [#allocation8], 0  ;;  %s3495_s27 = smov [#allocation4]  }
   0x3   :  { %s37_s28 = sshll.u32 %s3495_s27, 4  ;;  %s38_s28 = int_to_ptr.vmem [resolvable:$true] %s37_s28 }
   0x4   :  { %s3417_s29 = scalar_lea.vmem %s38_s28, 12288  ;;  %p3422_p1 = scmp.lt.s32.totalorder %s38_s28, %s38_s28 }
   0x5   :  { %p3418_p0 = scmp.ne.s32.totalorder %s38_s28, %s3417_s29  ;;  %p3423_p2 = scmp.lt.s32.totalorder %s3417_s29, %s3417_s29 }
   0x7   :  { %p3424_p3 = por %p3423_p2, %p3422_p1 }
   0x9   :  { %p3425_p4 = pnand %p3424_p3, %p3418_p0 }
   0xb   :  { %3428 = shalt.err (!%p3425_p4)
}
   0xc   :  { %s3496_s30 = smov 192   ;;  %s3497_s9 = smov 12  }
   0xd   :  { %43 = dma.hbm_to_vmem [thread:$0]  %s4119_s3, 12288, %s38_s28, [#allocation5], %s3496_s30, %s3496_s30, %s3497_s9  }
   0xe   :  { %s3498_s12 = smov [#allocation2]  }
   0xf   :  { %s23_s13 = sshll.u32 %s3498_s12, 4  ;;  %s24_s13 = int_to_ptr.vmem [resolvable:$true] %s23_s13 }
  0x10   :  { %s3437_s14 = scalar_lea.vmem %s24_s13, 4096  ;;  %p3442_p6 = scmp.lt.s32.totalorder %s24_s13, %s24_s13 }
  0x11   :  { %p3438_p5 = scmp.ne.s32.totalorder %s24_s13, %s3437_s14  ;;  %p3443_p7 = scmp.lt.s32.totalorder %s3437_s14, %s3437_s14 }
  0x13   :  { %p3444_p8 = por %p3443_p7, %p3442_p6 }
  0x15   :  { %p3445_p9 = pnand %p3444_p8, %p3438_p5 }
  0x17   :  { %3448 = shalt.err (!%p3445_p9)
}
  0x18   :  { %s3499_s15 = smov 256   ;;  %s3500_s16 = smov 16  }
  0x19   :  { %29 = dma.hbm_to_vmem [thread:$0]  %s4117_s1, 4096, %s24_s13, [#allocation3], %s3499_s15, %s3499_s15, %s3500_s16  }
  0x1a   :  { %s3501_s19 = smov [#allocation6]   ;;  %s3502_s21 = smov [#allocation7]  }
  0x1b   :  { %s49_s20 = sshll.u32 %s3501_s19, 4  ;;  %s63_s3 = sshll.u32 %s3502_s21, 4  ;;  %s50_s20 = int_to_ptr.vmem [resolvable:$true] %s49_s20  ;;  %s64_s3 = int_to_ptr.vmem [resolvable:$true] %s63_s3 }
  0x1c   :  { %s3457_s22 = scalar_lea.vmem %s50_s20, 3072  ;;  %p3462_p11 = scmp.lt.s32.totalorder %s50_s20, %s50_s20 }
  0x1d   :  { %p3458_p10 = scmp.ne.s32.totalorder %s50_s20, %s3457_s22  ;;  %p3463_p12 = scmp.lt.s32.totalorder %s3457_s22, %s3457_s22 }
  0x1f   :  { %p3464_p13 = por %p3463_p12, %p3462_p11 }
  0x21   :  { %p3465_p0 = pnand %p3464_p13, %p3458_p10 }
  0x23   :  { %3468 = shalt.err (!%p3465_p0)
}
  0x24   :  { %55 = dma.hbm_to_vmem [thread:$0]  %s4120_s4, 3072, %s50_s20, [#allocation5], %s3496_s30, %s3496_s30, %s3497_s9  }
  0x25   :  { %s3477_s1 = scalar_lea.vmem %s64_s3, 3072  ;;  %p3482_p2 = scmp.lt.s32.totalorder %s64_s3, %s64_s3 }
  0x26   :  { %p3478_p1 = scmp.ne.s32.totalorder %s64_s3, %s3477_s1  ;;  %p3483_p3 = scmp.lt.s32.totalorder %s3477_s1, %s3477_s1 }
  0x28   :  { %p3484_p4 = por %p3483_p3, %p3482_p2 }
  0x2a   :  { %p3485_p5 = pnand %p3484_p4, %p3478_p1 }
  0x2c   :  { %3488 = shalt.err (!%p3485_p5)
}
  0x2d   :  { %s3503_s25 = smov 64   ;;  %s3504_s26 = smov 4  }
  0x2e   :  { %69 = dma.hbm_to_vmem [thread:$0]  %s4122_s6, 3072, %s64_s3, [#allocation8], %s3503_s25, %s3503_s25, %s3504_s26  }
  0x2f   :  { %3489 = dma.done.wait [#allocation3], 4096  }
  0x30   :  { %3490 = vsyncadd [#allocation3], 4294963200 }
  0x31   :  { %3491 = dma.done.wait [#allocation5], 15360  }
  0x32   :  { %3492 = vsyncadd [#allocation5], 4294951936 }
  0x33   :  { %3493 = dma.done.wait [#allocation8], 3072  }
  0x34   :  { %3494 = vsyncadd [#allocation8], 4294964224  ;;  %v3505_v0 = vmov 0   ;;  %v3169_v1 = vld [vmem:[#allocation2 + $0xe4] ss:$16 sps:$4 sm:$0xff]   ;;  %v3583_v42 = vld [vmem:[%s4116_s0 + $0x8] sm:$0xff]  }
  0x35   :  { %395 = vmatprep.mubr.bf16.mxu0 %v3505_v0  ;;  %508 = vmatprep.mubr.bf16.mxu1 %v3505_v0  ;;  %v3171_v2 = vld [vmem:[#allocation2 + $0xec] ss:$16 sps:$4 sm:$0xff]   ;;  %v3173_v3 = vld [vmem:[#allocation2 + $0xe0] ss:$16 sps:$4 sm:$0xff]   ;;  %v3174_v4 = vld [vmem:[#allocation2 + $0xe8] ss:$16 sps:$4 sm:$0xff]  }
  0x36   :  { %363 = vmatprep.subr.bf16.mxu0 %v3169_v1  ;;  %476 = vmatprep.subr.bf16.mxu1 %v3171_v2  ;;  %v3175_v5 = vld [vmem:[#allocation2 + $0xc4] ss:$16 sps:$4 sm:$0xff]   ;;  %v3177_v6 = vld [vmem:[#allocation2 + $0xcc] ss:$16 sps:$4 sm:$0xff]   ;;  %v3179_v7 = vld [vmem:[#allocation2 + $0xc0] ss:$16 sps:$4 sm:$0xff]  }
  0x37   :  { %364 = vmatpush1.bf16.msra.mxu0 %v3173_v3  ;;  %477 = vmatpush1.bf16.msra.mxu1 %v3174_v4  ;;  %v3180_v8 = vld [vmem:[#allocation2 + $0xc8] ss:$16 sps:$4 sm:$0xff]   ;;  %v3181_v9 = vld [vmem:[#allocation2 + $0xa4] ss:$16 sps:$4 sm:$0xff]   ;;  %v3183_v10 = vld [vmem:[#allocation2 + $0xac] ss:$16 sps:$4 sm:$0xff]  }
  0x38   :  { %365 = vmatprep.subr.bf16.mxu0 %v3175_v5  ;;  %478 = vmatprep.subr.bf16.mxu1 %v3177_v6  ;;  %v3185_v11 = vld [vmem:[#allocation2 + $0xa0] ss:$16 sps:$4 sm:$0xff]   ;;  %v3186_v12 = vld [vmem:[#allocation2 + $0xa8] ss:$16 sps:$4 sm:$0xff]   ;;  %v3187_v13 = vld [vmem:[#allocation2 + $0x84] ss:$16 sps:$4 sm:$0xff]  }
  0x39   :  { %v3189_v14 = vld [vmem:[#allocation2 + $0x8c] ss:$16 sps:$4 sm:$0xff]   ;;  %v3191_v15 = vld [vmem:[#allocation2 + $0x80] ss:$16 sps:$4 sm:$0xff]   ;;  %v3192_v16 = vld [vmem:[#allocation2 + $0x88] ss:$16 sps:$4 sm:$0xff]  }
  0x3a   :  { %v3193_v17 = vld [vmem:[#allocation2 + $0x64] ss:$16 sps:$4 sm:$0xff]   ;;  %v3195_v18 = vld [vmem:[#allocation2 + $0x6c] ss:$16 sps:$4 sm:$0xff]   ;;  %v3197_v19 = vld [vmem:[#allocation2 + $0x60] ss:$16 sps:$4 sm:$0xff]  }
  0x3b   :  { %366 = vmatpush1.bf16.msra.mxu0 %v3179_v7  ;;  %479 = vmatpush1.bf16.msra.mxu1 %v3180_v8  ;;  %v3198_v20 = vld [vmem:[#allocation2 + $0x68] ss:$16 sps:$4 sm:$0xff]   ;;  %v3199_v21 = vld [vmem:[#allocation2 + $0x44] ss:$16 sps:$4 sm:$0xff]   ;;  %v3201_v22 = vld [vmem:[#allocation2 + $0x4c] ss:$16 sps:$4 sm:$0xff]  }
  0x3c   :  { %367 = vmatprep.subr.bf16.mxu0 %v3181_v9  ;;  %480 = vmatprep.subr.bf16.mxu1 %v3183_v10  ;;  %v3203_v23 = vld [vmem:[#allocation2 + $0x40] ss:$16 sps:$4 sm:$0xff]   ;;  %v3204_v24 = vld [vmem:[#allocation2 + $0x48] ss:$16 sps:$4 sm:$0xff]   ;;  %v3205_v25 = vld [vmem:[#allocation2 + $0x24] ss:$16 sps:$4 sm:$0xff]  }
  0x3d   :  { %v3207_v26 = vld [vmem:[#allocation2 + $0x2c] ss:$16 sps:$4 sm:$0xff]   ;;  %v3209_v27 = vld [vmem:[#allocation2 + $0x20] ss:$16 sps:$4 sm:$0xff]   ;;  %v3210_v28 = vld [vmem:[#allocation2 + $0x28] ss:$16 sps:$4 sm:$0xff]  }
  0x3e   :  { %v3211_v29 = vld [vmem:[#allocation2 + $0x4] ss:$16 sps:$4 sm:$0xff]   ;;  %v3213_v30 = vld [vmem:[#allocation2 + $0xc] ss:$16 sps:$4 sm:$0xff]   ;;  %v3215_v31 = vld [vmem:[#allocation2] ss:$16 sps:$4 sm:$0xff]  }
  0x3f   :  { %368 = vmatpush1.bf16.msra.mxu0 %v3185_v11  ;;  %481 = vmatpush1.bf16.msra.mxu1 %v3186_v12  ;;  %v3216_v32 = vld [vmem:[#allocation2 + $0x8] ss:$16 sps:$4 sm:$0xff]   ;;  %v3574_v33 = vld [vmem:[%s4116_s0] sm:$0xff]   ;;  %v3228_v35 = vld [vmem:[#allocation6 + $0xb0] ss:$12 sps:$4 sm:$0xff]  }
  0x40   :  { %369 = vmatprep.subr.bf16.mxu0 %v3187_v13  ;;  %482 = vmatprep.subr.bf16.mxu1 %v3189_v14  ;;  %v3227_v34 = vld [vmem:[#allocation6 + $0xac] ss:$12 sps:$4 sm:$0xff]   ;;  %v3225_v36 = vld [vmem:[#allocation6 + $0xa8] ss:$12 sps:$4 sm:$0xff]   ;;  %v3229_v39 = vld [vmem:[#allocation6 + $0x90] ss:$12 sps:$4 sm:$0xff]  }
  0x41   :  { %v3231_v37 = vld [vmem:[#allocation6 + $0x94] ss:$12 sps:$4 sm:$0xff]   ;;  %v3232_v38 = vld [vmem:[#allocation6 + $0x98] ss:$12 sps:$4 sm:$0xff]   ;;  %v3235_v40 = vld [vmem:[#allocation6 + $0x7c] ss:$12 sps:$4 sm:$0xff]  }
  0x42   :  { %v3236_v41 = vld [vmem:[#allocation6 + $0x80] ss:$12 sps:$4 sm:$0xff]   ;;  %v3233_v43 = vld [vmem:[#allocation6 + $0x78] ss:$12 sps:$4 sm:$0xff]   ;;  %v3240_v45 = vld [vmem:[#allocation6 + $0x68] ss:$12 sps:$4 sm:$0xff]  }
  0x43   :  { %370 = vmatpush1.bf16.msra.mxu0 %v3191_v15  ;;  %483 = vmatpush1.bf16.msra.mxu1 %v3192_v16  ;;  %v3239_v44 = vld [vmem:[#allocation6 + $0x64] ss:$12 sps:$4 sm:$0xff]   ;;  %v3237_v46 = vld [vmem:[#allocation6 + $0x60] ss:$12 sps:$4 sm:$0xff]   ;;  %v3241_v50 = vld [vmem:[#allocation6 + $0x48] ss:$12 sps:$4 sm:$0xff]  }
  0x44   :  { %371 = vmatprep.subr.bf16.mxu0 %v3193_v17  ;;  %484 = vmatprep.subr.bf16.mxu1 %v3195_v18  ;;  %v3243_v47 = vld [vmem:[#allocation6 + $0x4c] ss:$12 sps:$4 sm:$0xff]   ;;  %v3244_v48 = vld [vmem:[#allocation6 + $0x50] ss:$12 sps:$4 sm:$0xff]   ;;  %v3247_v51 = vld [vmem:[#allocation6 + $0x34] ss:$12 sps:$4 sm:$0xff]  }
  0x45   :  { %v3592_v49 = vld [vmem:[%s4116_s0 + $0x10] sm:$0xff]   ;;  %v3248_v52 = vld [vmem:[#allocation6 + $0x38] ss:$12 sps:$4 sm:$0xff]   ;;  %v3251_v54 = vld [vmem:[#allocation6 + $0x1c] ss:$12 sps:$4 sm:$0xff]  }
  0x46   :  { %v3245_v53 = vld [vmem:[#allocation6 + $0x30] ss:$12 sps:$4 sm:$0xff]   ;;  %v3252_v55 = vld [vmem:[#allocation6 + $0x20] ss:$12 sps:$4 sm:$0xff]   ;;  %v3249_v57 = vld [vmem:[#allocation6 + $0x18] ss:$12 sps:$4 sm:$0xff]  }
  0x47   :  { %372 = vmatpush1.bf16.msra.mxu0 %v3197_v19  ;;  %485 = vmatpush1.bf16.msra.mxu1 %v3198_v20  ;;  %v3601_v56 = vld [vmem:[%s4116_s0 + $0x18] sm:$0xff]   ;;  %v3255_v58 = vld [vmem:[#allocation6 + $0x4] ss:$12 sps:$4 sm:$0xff]   ;;  %v3256_v59 = vld [vmem:[#allocation6 + $0x8] ss:$12 sps:$4 sm:$0xff]  }
  0x48   :  { %373 = vmatprep.subr.bf16.mxu0 %v3199_v21  ;;  %486 = vmatprep.subr.bf16.mxu1 %v3201_v22  ;;  %v3253_v60 = vld [vmem:[#allocation6] ss:$12 sps:$4 sm:$0xff]   ;;  %v3628_v2 = vld [vmem:[%s4116_s0 + $0x30] sm:$0xff]   ;;  %v3637_v3 = vld [vmem:[%s4116_s0 + $0x38] sm:$0xff]  }
  0x49   :  { %v3259_v61 = vld [vmem:[#allocation4 + $0xac] ss:$12 sps:$4 sm:$0xff]   ;;  %v3610_v63 = vld [vmem:[%s4116_s0 + $0x20] sm:$0xff]   ;;  %v3257_v4 = vld [vmem:[#allocation4 + $0xa8] ss:$12 sps:$4 sm:$0xff]  }
  0x4a   :  { %v3262_v62 = vld [vmem:[#allocation4 + $0x22c] ss:$12 sps:$4 sm:$0xff]   ;;  %v3260_v5 = vld [vmem:[#allocation4 + $0x228] ss:$12 sps:$4 sm:$0xff]   ;;  %v3263_v8 = vld [vmem:[#allocation4 + $0x90] ss:$12 sps:$4 sm:$0xff]  }
  0x4b   :  { %374 = vmatpush1.bf16.msra.mxu0 %v3203_v23  ;;  %487 = vmatpush1.bf16.msra.mxu1 %v3204_v24  ;;  %v3619_v1 = vld [vmem:[%s4116_s0 + $0x28] sm:$0xff]   ;;  %v3265_v6 = vld [vmem:[#allocation4 + $0x94] ss:$12 sps:$4 sm:$0xff]   ;;  %v3266_v9 = vld [vmem:[#allocation4 + $0x210] ss:$12 sps:$4 sm:$0xff]  }
  0x4c   :  { %375 = vmatprep.subr.bf16.mxu0 %v3205_v25  ;;  %488 = vmatprep.subr.bf16.mxu1 %v3207_v26  ;;  %v3268_v7 = vld [vmem:[#allocation4 + $0x214] ss:$12 sps:$4 sm:$0xff]   ;;  %v3271_v10 = vld [vmem:[#allocation4 + $0x7c] ss:$12 sps:$4 sm:$0xff]   ;;  %v3269_v12 = vld [vmem:[#allocation4 + $0x78] ss:$12 sps:$4 sm:$0xff]  }
  0x4d   :  { %v3274_v11 = vld [vmem:[#allocation4 + $0x1fc] ss:$12 sps:$4 sm:$0xff]   ;;  %v3272_v13 = vld [vmem:[#allocation4 + $0x1f8] ss:$12 sps:$4 sm:$0xff]   ;;  %v3275_v16 = vld [vmem:[#allocation4 + $0x60] ss:$12 sps:$4 sm:$0xff]  }
  0x4e   :  { %v3277_v14 = vld [vmem:[#allocation4 + $0x64] ss:$12 sps:$4 sm:$0xff]   ;;  %v3278_v17 = vld [vmem:[#allocation4 + $0x1e0] ss:$12 sps:$4 sm:$0xff]   ;;  %v3281_v20 = vld [vmem:[#allocation4 + $0x48] ss:$12 sps:$4 sm:$0xff]  }
  0x4f   :  { %376 = vmatpush1.bf16.msra.mxu0 %v3209_v27  ;;  %489 = vmatpush1.bf16.msra.mxu1 %v3210_v28  ;;  %v3280_v15 = vld [vmem:[#allocation4 + $0x1e4] ss:$12 sps:$4 sm:$0xff]   ;;  %v3283_v18 = vld [vmem:[#allocation4 + $0x4c] ss:$12 sps:$4 sm:$0xff]   ;;  %v3284_v21 = vld [vmem:[#allocation4 + $0x1c8] ss:$12 sps:$4 sm:$0xff]  }
  0x50   :  { %377 = vmatprep.subr.bf16.mxu0 %v3211_v29  ;;  %490 = vmatprep.subr.bf16.mxu1 %v3213_v30  ;;  %v3286_v19 = vld [vmem:[#allocation4 + $0x1cc] ss:$12 sps:$4 sm:$0xff]   ;;  %v3289_v22 = vld [vmem:[#allocation4 + $0x34] ss:$12 sps:$4 sm:$0xff]   ;;  %v3287_v24 = vld [vmem:[#allocation4 + $0x30] ss:$12 sps:$4 sm:$0xff]  }
  0x51   :  { %v3292_v23 = vld [vmem:[#allocation4 + $0x1b4] ss:$12 sps:$4 sm:$0xff]   ;;  %v3290_v25 = vld [vmem:[#allocation4 + $0x1b0] ss:$12 sps:$4 sm:$0xff]   ;;  %v3293_v28 = vld [vmem:[#allocation4 + $0x18] ss:$12 sps:$4 sm:$0xff]  }
  0x52   :  { %v3295_v26 = vld [vmem:[#allocation4 + $0x1c] ss:$12 sps:$4 sm:$0xff]   ;;  %v3296_v29 = vld [vmem:[#allocation4 + $0x198] ss:$12 sps:$4 sm:$0xff]  }
  0x53   :  { %378 = vmatpush1.bf16.msra.mxu0 %v3215_v31  ;;  %491 = vmatpush1.bf16.msra.mxu1 %v3216_v32  ;;  %v3298_v27 = vld [vmem:[#allocation4 + $0x19c] ss:$12 sps:$4 sm:$0xff]   ;;  %v3301_v30 = vld [vmem:[#allocation4 + $0x4] ss:$12 sps:$4 sm:$0xff]   ;;  %v3299_v32 = vld [vmem:[#allocation4] ss:$12 sps:$4 sm:$0xff]  }
  0x54   :  { %973 = vmatprep.subr.bf16.mxu0 %v3227_v34  ;;  %3094 = vmatprep.subr.bf16.mxu1 %v3228_v35  ;;  %v3304_v31 = vld [vmem:[#allocation4 + $0x184] ss:$12 sps:$4 sm:$0xff]   ;;  %v3307_v34 = vld [vmem:[#allocation4 + $0x16c] ss:$12 sps:$4 sm:$0xff]  }
  0x56   :  { %396 = vmatmul.mubr.bf16.vlgmr.msra.gmra.mxu0 %v3574_v33  ;;  %509 = vmatmul.mubr.bf16.vlgmr.msra.gmra.mxu1 %v3574_v33 }
  0x57   :  { %405 = vmatprep.mubr.bf16.mxu0 %v3505_v0  ;;  %518 = vmatprep.mubr.bf16.mxu1 %v3505_v0 }
  0x58   :  { %974 = vmatpush1.bf16.msra.mxu0 %v3225_v36  ;;  %3095 = vmatpush3.bf16.msra.mxu1 %v3228_v35  ;;  %v3310_v35 = vld [vmem:[#allocation4 + $0x2ec] ss:$12 sps:$4 sm:$0xff]   ;;  %v3305_v36 = vld [vmem:[#allocation4 + $0x168] ss:$12 sps:$4 sm:$0xff]  }
  0x59   :  { %975 = vmatprep.subr.bf16.mxu0 %v3231_v37  ;;  %3096 = vmatprep.subr.bf16.mxu1 %v3232_v38  ;;  %v3308_v37 = vld [vmem:[#allocation4 + $0x2e8] ss:$12 sps:$4 sm:$0xff]  }
  0x5c   :  { %976 = vmatpush1.bf16.msra.mxu0 %v3229_v39  ;;  %3097 = vmatpush3.bf16.msra.mxu1 %v3232_v38  ;;  %v3313_v38 = vld [vmem:[#allocation4 + $0x154] ss:$12 sps:$4 sm:$0xff]  }
  0x5d   :  { %977 = vmatprep.subr.bf16.mxu0 %v3235_v40  ;;  %3098 = vmatprep.subr.bf16.mxu1 %v3236_v41  ;;  %v3316_v39 = vld [vmem:[#allocation4 + $0x2d4] ss:$12 sps:$4 sm:$0xff]   ;;  %v3311_v40 = vld [vmem:[#allocation4 + $0x150] ss:$12 sps:$4 sm:$0xff]  }
  0x5e   :  { %406 = vmatmul.mubr.bf16.gmra.mxu0 %v3583_v42  ;;  %519 = vmatmul.mubr.bf16.gmra.mxu1 %v3583_v42 }
  0x5f   :  { %415 = vmatprep.mubr.bf16.mxu0 %v3505_v0  ;;  %528 = vmatprep.mubr.bf16.mxu1 %v3505_v0 }
  0x60   :  { %978 = vmatpush1.bf16.msra.mxu0 %v3233_v43  ;;  %3099 = vmatpush3.bf16.msra.mxu1 %v3236_v41  ;;  %v3314_v41 = vld [vmem:[#allocation4 + $0x2d0] ss:$12 sps:$4 sm:$0xff]  }
  0x61   :  { %979 = vmatprep.subr.bf16.mxu0 %v3239_v44  ;;  %3100 = vmatprep.subr.bf16.mxu1 %v3240_v45  ;;  %v3322_v43 = vld [vmem:[#allocation4 + $0x2bc] ss:$12 sps:$4 sm:$0xff]   ;;  %v3317_v44 = vld [vmem:[#allocation4 + $0x138] ss:$12 sps:$4 sm:$0xff]  }
  0x64   :  { %980 = vmatpush1.bf16.msra.mxu0 %v3237_v46  ;;  %3101 = vmatpush3.bf16.msra.mxu1 %v3240_v45  ;;  %v3320_v45 = vld [vmem:[#allocation4 + $0x2b8] ss:$12 sps:$4 sm:$0xff]  }
  0x65   :  { %981 = vmatprep.subr.bf16.mxu0 %v3243_v47  ;;  %3102 = vmatprep.subr.bf16.mxu1 %v3244_v48  ;;  %v3325_v46 = vld [vmem:[#allocation4 + $0x124] ss:$12 sps:$4 sm:$0xff]  }
  0x66   :  { %416 = vmatmul.mubr.bf16.gmra.mxu0 %v3592_v49  ;;  %529 = vmatmul.mubr.bf16.gmra.mxu1 %v3592_v49  ;;  %v3328_v47 = vld [vmem:[#allocation4 + $0x2a4] ss:$12 sps:$4 sm:$0xff]  }
  0x67   :  { %425 = vmatprep.mubr.bf16.mxu0 %v3505_v0  ;;  %538 = vmatprep.mubr.bf16.mxu1 %v3505_v0 }
  0x68   :  { %982 = vmatpush1.bf16.msra.mxu0 %v3241_v50  ;;  %3103 = vmatpush3.bf16.msra.mxu1 %v3244_v48  ;;  %v3323_v48 = vld [vmem:[#allocation4 + $0x120] ss:$12 sps:$4 sm:$0xff]  }
  0x69   :  { %983 = vmatprep.subr.bf16.mxu0 %v3247_v51  ;;  %3104 = vmatprep.subr.bf16.mxu1 %v3248_v52  ;;  %v3331_v50 = vld [vmem:[#allocation4 + $0x10c] ss:$12 sps:$4 sm:$0xff]  }
  0x6a   :  { %v3334_v51 = vld [vmem:[#allocation4 + $0x28c] ss:$12 sps:$4 sm:$0xff]  }
  0x6c   :  { %984 = vmatpush1.bf16.msra.mxu0 %v3245_v53  ;;  %3105 = vmatpush3.bf16.msra.mxu1 %v3248_v52  ;;  %v3329_v52 = vld [vmem:[#allocation4 + $0x108] ss:$12 sps:$4 sm:$0xff]  }
  0x6d   :  { %985 = vmatprep.subr.bf16.mxu0 %v3251_v54  ;;  %3106 = vmatprep.subr.bf16.mxu1 %v3252_v55  ;;  %v3332_v53 = vld [vmem:[#allocation4 + $0x288] ss:$12 sps:$4 sm:$0xff]  }
  0x6e   :  { %426 = vmatmul.mubr.bf16.gmra.mxu0 %v3601_v56  ;;  %539 = vmatmul.mubr.bf16.gmra.mxu1 %v3601_v56  ;;  %v3337_v54 = vld [vmem:[#allocation4 + $0xf4] ss:$12 sps:$4 sm:$0xff]  }
  0x6f   :  { %435 = vmatprep.mubr.bf16.mxu0 %v3505_v0  ;;  %548 = vmatprep.mubr.bf16.mxu1 %v3505_v0 }
  0x70   :  { %986 = vmatpush1.bf16.msra.mxu0 %v3249_v57  ;;  %3107 = vmatpush3.bf16.msra.mxu1 %v3252_v55  ;;  %v3340_v55 = vld [vmem:[#allocation4 + $0x274] ss:$12 sps:$4 sm:$0xff]   ;;  %v3338_v57 = vld [vmem:[#allocation4 + $0x270] ss:$12 sps:$4 sm:$0xff]  }
  0x71   :  { %987 = vmatprep.subr.bf16.mxu0 %v3255_v58  ;;  %3108 = vmatprep.subr.bf16.mxu1 %v3256_v59  ;;  %v3343_v58 = vld [vmem:[#allocation4 + $0xdc] ss:$12 sps:$4 sm:$0xff]  }
  0x74   :  { %988 = vmatpush1.bf16.msra.mxu0 %v3253_v60  ;;  %3109 = vmatpush3.bf16.msra.mxu1 %v3256_v59  ;;  %v3346_v59 = vld [vmem:[#allocation4 + $0x25c] ss:$12 sps:$4 sm:$0xff]   ;;  %v3341_v60 = vld [vmem:[#allocation4 + $0xd8] ss:$12 sps:$4 sm:$0xff]  }
  0x75   :  { %1695 = vmatprep.subr.bf16.mxu0 %v3259_v61  ;;  %1808 = vmatprep.subr.bf16.mxu1 %v3262_v62  ;;  %v3344_v61 = vld [vmem:[#allocation4 + $0x258] ss:$12 sps:$4 sm:$0xff]  }
  0x76   :  { %436 = vmatmul.mubr.bf16.gmra.mxu0 %v3610_v63  ;;  %549 = vmatmul.mubr.bf16.gmra.mxu1 %v3610_v63  ;;  %v3349_v62 = vld [vmem:[#allocation4 + $0xc4] ss:$12 sps:$4 sm:$0xff]  }
  0x77   :  { %445 = vmatprep.mubr.bf16.mxu0 %v3505_v0  ;;  %558 = vmatprep.mubr.bf16.mxu1 %v3505_v0 }
  0x7e   :  { %446 = vmatmul.mubr.bf16.gmra.mxu0 %v3619_v1  ;;  %559 = vmatmul.mubr.bf16.gmra.mxu1 %v3619_v1 }
  0x7f   :  { %455 = vmatprep.mubr.bf16.mxu0 %v3505_v0  ;;  %568 = vmatprep.mubr.bf16.mxu1 %v3505_v0 }
  0x86   :  { %456 = vmatmul.mubr.bf16.gmra.mxu0 %v3628_v2  ;;  %569 = vmatmul.mubr.bf16.gmra.mxu1 %v3628_v2 }
  0x87   :  { %465 = vmatprep.mubr.bf16.mxu0 %v3505_v0  ;;  %578 = vmatprep.mubr.bf16.mxu1 %v3505_v0 }
  0x8e   :  { %466 = vmatmul.mubr.bf16.gmra.mxu0 %v3637_v3  ;;  %579 = vmatmul.mubr.bf16.gmra.mxu1 %v3637_v3 }
  0x8f   :  { %1005 = vmatprep.mubr.bf16.mxu0 %v3505_v0  ;;  %3110 = vmatprep.mubr.bf16.mxu1 %v3574_v33 }
  0x96   :  { %1006 = vmatmul.mubr.bf16.vlgmr.msra.gmra.mxu0 %v3574_v33  ;;  %3111 = vmatmul.mubr.bf16.vlgmr.msra.gmra.mxu1 %v3583_v42  ;;  %v3302_v33 = vld [vmem:[#allocation4 + $0x180] ss:$12 sps:$4 sm:$0xff]  }
  0x97   :  { %1696 = vmatpush1.bf16.msra.mxu0 %v3257_v4  ;;  %1015 = vmatprep.mubr.bf16.mxu0 %v3505_v0  ;;  %v3355_v4 = vld [vmem:[#allocation4 + $0x2f0] ss:$12 sps:$4 sm:$0xff]  }
  0x98   :  { %1809 = vmatpush1.bf16.msra.mxu1 %v3260_v5  ;;  %1697 = vmatprep.subr.bf16.mxu0 %v3265_v6  ;;  %v135_v5 = vlaneseq }
  0x99   :  { %1810 = vmatprep.subr.bf16.mxu1 %v3268_v7  ;;  %3114 = vmatprep.mubr.bf16.mxu1 %v3592_v49 }
  0x9a   :  { %v3665_v6 = vshrl.u32 %v135_v5, 7  ;;  %v3360_v5 = vld [vmem:[#allocation4 + $0x218] ss:$12 sps:$4 sm:$0xff]  }
  0x9b   :  { %1698 = vmatpush1.bf16.msra.mxu0 %v3263_v8 }
  0x9c   :  { %1811 = vmatpush1.bf16.msra.mxu1 %v3266_v9  ;;  %1699 = vmatprep.subr.bf16.mxu0 %v3271_v10  ;;  %v141_v7 = vsub.s32 1, %v3665_v6  ;;  %v149_v8 = vsub.s32 3, %v3665_v6  ;;  %v4125_v9 = vsub.s32 2, %v3665_v6  ;;  %v133_v10 = vld [vmem:[%s4118_s2] sm:$0xf] }
  0x9d   :  { %1812 = vmatprep.subr.bf16.mxu1 %v3274_v11 }
  0x9e   :  { %1016 = vmatmul.mubr.bf16.gmra.mxu0 %v3583_v42  ;;  %3115 = vmatmul.mubr.bf16.gmra.mxu1 %v3601_v56  ;;  %v3319_v42 = vld [vmem:[#allocation4 + $0x13c] ss:$12 sps:$4 sm:$0xff]  }
  0x9f   :  { %1700 = vmatpush1.bf16.msra.mxu0 %v3269_v12  ;;  %1025 = vmatprep.mubr.bf16.mxu0 %v3505_v0 }
  0xa0   :  { %1813 = vmatpush1.bf16.msra.mxu1 %v3272_v13  ;;  %1701 = vmatprep.subr.bf16.mxu0 %v3277_v14  ;;  %v3676_v13 = vrot.slane %v133_v10, %v141_v7  ;;  %v3678_v14 = vrot.slane %v133_v10, %v149_v8  ;;  %v3361_v8 = vld [vmem:[#allocation4 + $0x140] ss:$12 sps:$4 sm:$0xff]  }
  0xa1   :  { %1814 = vmatprep.subr.bf16.mxu1 %v3280_v15  ;;  %3118 = vmatprep.mubr.bf16.mxu1 %v3610_v63 }
  0xa3   :  { %1702 = vmatpush1.bf16.msra.mxu0 %v3275_v16  ;;  %v3686_v16 = vrot.slane %v133_v10, %v4125_v9 }
  0xa4   :  { %1815 = vmatpush1.bf16.msra.mxu1 %v3278_v17  ;;  %1703 = vmatprep.subr.bf16.mxu0 %v3283_v18 }
  0xa5   :  { %1816 = vmatprep.subr.bf16.mxu1 %v3286_v19 }
  0xa6   :  { %1026 = vmatmul.mubr.bf16.gmra.mxu0 %v3592_v49  ;;  %3119 = vmatmul.mubr.bf16.gmra.mxu1 %v3619_v1  ;;  %v3326_v49 = vld [vmem:[#allocation4 + $0x2a0] ss:$12 sps:$4 sm:$0xff]  }
  0xa7   :  { %1704 = vmatpush1.bf16.msra.mxu0 %v3281_v20  ;;  %1035 = vmatprep.mubr.bf16.mxu0 %v3505_v0 }
  0xa8   :  { %1817 = vmatpush1.bf16.msra.mxu1 %v3284_v21  ;;  %1705 = vmatprep.subr.bf16.mxu0 %v3289_v22 }
  0xa9   :  { %1818 = vmatprep.subr.bf16.mxu1 %v3292_v23  ;;  %3122 = vmatprep.mubr.bf16.mxu1 %v3628_v2 }
  0xab   :  { %1706 = vmatpush1.bf16.msra.mxu0 %v3287_v24 }
  0xac   :  { %1819 = vmatpush1.bf16.msra.mxu1 %v3290_v25  ;;  %1707 = vmatprep.subr.bf16.mxu0 %v3295_v26 }
  0xad   :  { %1820 = vmatprep.subr.bf16.mxu1 %v3298_v27 }
  0xae   :  { %1036 = vmatmul.mubr.bf16.gmra.mxu0 %v3601_v56  ;;  %3123 = vmatmul.mubr.bf16.gmra.mxu1 %v3637_v3  ;;  %v3335_v56 = vld [vmem:[#allocation4 + $0xf0] ss:$12 sps:$4 sm:$0xff]  }
  0xaf   :  { %1708 = vmatpush1.bf16.msra.mxu0 %v3293_v28  ;;  %1045 = vmatprep.mubr.bf16.mxu0 %v3505_v0 }
  0xb0   :  { %1821 = vmatpush1.bf16.msra.mxu1 %v3296_v29  ;;  %1709 = vmatprep.subr.bf16.mxu0 %v3301_v30 }
  0xb1   :  { %1822 = vmatprep.subr.bf16.mxu1 %v3304_v31 }
  0xb3   :  { %1710 = vmatpush1.bf16.msra.mxu0 %v3299_v32 }
  0xb4   :  { %1823 = vmatpush1.bf16.msra.mxu1 %v3302_v33  ;;  %1711 = vmatprep.subr.bf16.mxu0 %v3307_v34 }
  0xb5   :  { %1824 = vmatprep.subr.bf16.mxu1 %v3310_v35 }
  0xb6   :  { %1046 = vmatmul.mubr.bf16.gmra.mxu0 %v3610_v63  ;;  %v3352_v63 = vld [vmem:[#allocation4 + $0x244] ss:$12 sps:$4 sm:$0xff]  }
  0xb7   :  { %1712 = vmatpush2.bf16.msra.mxu0 %v3305_v36  ;;  %1055 = vmatprep.mubr.bf16.mxu0 %v3505_v0 }
  0xb8   :  { %1825 = vmatpush2.bf16.msra.mxu1 %v3308_v37  ;;  %1713 = vmatprep.subr.bf16.mxu0 %v3313_v38 }
  0xb9   :  { %1826 = vmatprep.subr.bf16.mxu1 %v3316_v39 }
  0xbb   :  { %1714 = vmatpush2.bf16.msra.mxu0 %v3311_v40 }
  0xbc   :  { %1827 = vmatpush2.bf16.msra.mxu1 %v3314_v41  ;;  %1715 = vmatprep.subr.bf16.mxu0 %v3319_v42 }
  0xbd   :  { %1828 = vmatprep.subr.bf16.mxu1 %v3322_v43 }
  0xbe   :  { %1056 = vmatmul.mubr.bf16.gmra.mxu0 %v3619_v1  ;;  %v3347_v1 = vld [vmem:[#allocation4 + $0xc0] ss:$12 sps:$4 sm:$0xff]  }
  0xbf   :  { %1716 = vmatpush2.bf16.msra.mxu0 %v3317_v44  ;;  %1065 = vmatprep.mubr.bf16.mxu0 %v3505_v0 }
  0xc0   :  { %1829 = vmatpush2.bf16.msra.mxu1 %v3320_v45  ;;  %1717 = vmatprep.subr.bf16.mxu0 %v3325_v46  ;;  %v3354_v45 = vld [vmem:[#allocation4 + $0xb0] ss:$12 sps:$4 sm:$0xff]  }
  0xc1   :  { %1830 = vmatprep.subr.bf16.mxu1 %v3328_v47  ;;  %v3356_v46 = vld [vmem:[#allocation4 + $0x230] ss:$12 sps:$4 sm:$0xff]  }
  0xc3   :  { %1718 = vmatpush2.bf16.msra.mxu0 %v3323_v48 }
  0xc4   :  { %1831 = vmatpush2.bf16.msra.mxu1 %v3326_v49  ;;  %1719 = vmatprep.subr.bf16.mxu0 %v3331_v50 }
  0xc5   :  { %1832 = vmatprep.subr.bf16.mxu1 %v3334_v51 }
  0xc6   :  { %1066 = vmatmul.mubr.bf16.gmra.mxu0 %v3628_v2  ;;  %v3353_v2 = vld [vmem:[#allocation4 + $0x170] ss:$12 sps:$4 sm:$0xff]  }
  0xc7   :  { %1720 = vmatpush2.bf16.msra.mxu0 %v3329_v52  ;;  %1075 = vmatprep.mubr.bf16.mxu0 %v3505_v0  ;;  %v3350_v0 = vld [vmem:[#allocation4 + $0x240] ss:$12 sps:$4 sm:$0xff]   ;;  %v3357_v52 = vld [vmem:[#allocation4 + $0x158] ss:$12 sps:$4 sm:$0xff]  }
  0xc8   :  { %1833 = vmatpush2.bf16.msra.mxu1 %v3332_v53  ;;  %1721 = vmatprep.subr.bf16.mxu0 %v3337_v54  ;;  %v3359_v53 = vld [vmem:[#allocation4 + $0x2d8] ss:$12 sps:$4 sm:$0xff]  }
  0xc9   :  { %1834 = vmatprep.subr.bf16.mxu1 %v3340_v55 }
  0xcb   :  { %1722 = vmatpush2.bf16.msra.mxu0 %v3335_v56 }
  0xcc   :  { %1835 = vmatpush2.bf16.msra.mxu1 %v3338_v57  ;;  %1723 = vmatprep.subr.bf16.mxu0 %v3343_v58 }
  0xcd   :  { %1836 = vmatprep.subr.bf16.mxu1 %v3346_v59 }
  0xce   :  { %1076 = vmatmul.mubr.bf16.gmra.mxu0 %v3637_v3  ;;  %v137_v3 = vsub.s32 0, %v3665_v6 }
  0xcf   :  { %1724 = vmatpush2.bf16.msra.mxu0 %v3341_v60 }
  0xd0   :  { %1837 = vmatpush2.bf16.msra.mxu1 %v3344_v61  ;;  %1725 = vmatprep.subr.bf16.mxu0 %v3349_v62  ;;  %v3682_v15 = vrot.slane %v133_v10, %v137_v3 }
  0xd1   :  { %1838 = vmatprep.subr.bf16.mxu1 %v3352_v63  ;;  %v3358_v63 = vld [vmem:[#allocation4 + $0x98] ss:$12 sps:$4 sm:$0xff]  }
  0xd3   :  { %1726 = vmatpush2.bf16.msra.mxu0 %v3347_v1 }
  0xd4   :  { %1839 = vmatpush2.bf16.msra.mxu1 %v3350_v0  ;;  %2886 = vmatprep.subr.bf16.mxu0 %v3353_v2 }
  0xd5   :  { %2950 = vmatprep.subr.bf16.mxu1 %v3355_v4 }
 0x116   :  { %v397_v11 = vpop.f32.mrf.mxu0  ;;  %v510_v12 = vpop.f32.mrf.mxu1 }
 0x117   :  { %v398_v25 = vadd.f32 %v397_v11, %v3682_v15  ;;  %v511_v26 = vadd.f32 %v510_v12, %v3686_v16 }
 0x118   :  { %v399_v17 = vpop.f32.mrf.mxu0  ;;  %v512_v18 = vpop.f32.mrf.mxu1 }
 0x119   :  { %v400_v21 = vadd.f32 %v399_v17, %v3676_v13  ;;  %v513_v22 = vadd.f32 %v512_v18, %v3678_v14  ;;  %v589_v39 = vmax.f32 %v398_v25, 0.0  ;;  %v591_v40 = vmax.f32 %v511_v26, 0.0  ;;  %v3363_v25 = vld [vmem:[#allocation4 + $0x2c0] ss:$12 sps:$4 sm:$0xff]  }
 0x11a   :  { %v401_v19 = vpop.f32.mrf.mxu0  ;;  %v514_v20 = vpop.f32.mrf.mxu1 }
 0x11b   :  { %v402_v23 = vadd.f32 %v401_v19, %v3682_v15  ;;  %v515_v24 = vadd.f32 %v514_v20, %v3686_v16  ;;  %v590_v35 = vmax.f32 %v400_v21, 0.0  ;;  %v592_v36 = vmax.f32 %v513_v22, 0.0 }
 0x11c   :  { %v403_v27 = vpop.f32.mrf.mxu0  ;;  %v516_v28 = vpop.f32.mrf.mxu1 }
 0x11d   :  { %v404_v29 = vadd.f32 %v403_v27, %v3676_v13  ;;  %v517_v30 = vadd.f32 %v516_v28, %v3678_v14  ;;  %v593_v31 = vmax.f32 %v402_v23, 0.0  ;;  %v595_v32 = vmax.f32 %v515_v24, 0.0  ;;  %v3362_v24 = vld [vmem:[#allocation4 + $0x80] ss:$12 sps:$4 sm:$0xff]  }
 0x11e   :  { %v407_v33 = vpop.f32.mrf.mxu0  ;;  %v520_v34 = vpop.f32.mrf.mxu1 }
 0x11f   :  { %v594_v37 = vmax.f32 %v404_v29, 0.0  ;;  %v596_v38 = vmax.f32 %v517_v30, 0.0  ;;  %v3700_v47 = vpack.c.bf16 %v593_v31, %v589_v39  ;;  %v3702_v48 = vpack.c.bf16 %v595_v32, %v591_v40  ;;  %v3364_v31 = vld [vmem:[#allocation4 + $0x200] ss:$12 sps:$4 sm:$0xff]   ;;  %v3365_v32 = vld [vmem:[#allocation4 + $0x128] ss:$12 sps:$4 sm:$0xff]  }
 0x120   :  { %v409_v41 = vpop.f32.mrf.mxu0  ;;  %v522_v42 = vpop.f32.mrf.mxu1  ;;  %v408_v57 = vadd.f32 %v407_v33, %v3682_v15  ;;  %v521_v58 = vadd.f32 %v520_v34, %v3686_v16 }
 0x121   :  { %v3696_v43 = vpack.c.bf16 %v594_v37, %v590_v35  ;;  %v3698_v44 = vpack.c.bf16 %v596_v38, %v592_v36  ;;  %v410_v49 = vadd.f32 %v409_v41, %v3676_v13  ;;  %v523_v54 = vadd.f32 %v522_v42, %v3678_v14  ;;  %v3367_v36 = vld [vmem:[#allocation4 + $0x2a8] ss:$12 sps:$4 sm:$0xff]  }
 0x122   :  { %v411_v50 = vpop.f32.mrf.mxu0  ;;  %v524_v51 = vpop.f32.mrf.mxu1  ;;  %v597_v18 = vmax.f32 %v408_v57, 0.0  ;;  %v599_v19 = vmax.f32 %v521_v58, 0.0 }
 0x123   :  { %v412_v55 = vadd.f32 %v411_v50, %v3682_v15  ;;  %v525_v56 = vadd.f32 %v524_v51, %v3686_v16  ;;  %1727 = vmatprep.mubr.bf16.mxu0 %v3696_v43  ;;  %1840 = vmatprep.mubr.bf16.mxu1 %v3698_v44  ;;  %v598_v10 = vmax.f32 %v410_v49, 0.0  ;;  %v600_v11 = vmax.f32 %v523_v54, 0.0 }
 0x124   :  { %v413_v59 = vpop.f32.mrf.mxu0  ;;  %v526_v60 = vpop.f32.mrf.mxu1  ;;  %1728 = vmatmul.mubr.bf16.vlgmr.msra.gmra.mxu0 %v3700_v47  ;;  %1841 = vmatmul.mubr.bf16.vlgmr.msra.gmra.mxu1 %v3702_v48 }
 0x125   :  { %v414_v61 = vadd.f32 %v413_v59, %v3676_v13  ;;  %v527_v62 = vadd.f32 %v526_v60, %v3678_v14  ;;  %2887 = vmatpush3.bf16.msra.mxu0 %v3354_v45  ;;  %2951 = vmatpush3.bf16.msra.mxu1 %v3356_v46  ;;  %v601_v1 = vmax.f32 %v412_v55, 0.0  ;;  %v603_v0 = vmax.f32 %v525_v56, 0.0  ;;  %v3366_v45 = vld [vmem:[#allocation4 + $0x68] ss:$12 sps:$4 sm:$0xff]  }
 0x126   :  { %v417_v2 = vpop.f32.mrf.mxu0  ;;  %v530_v4 = vpop.f32.mrf.mxu1  ;;  %2888 = vmatprep.subr.bf16.mxu0 %v3357_v52  ;;  %2952 = vmatprep.subr.bf16.mxu1 %v3359_v53  ;;  %v3368_v52 = vld [vmem:[#allocation4 + $0x1e8] ss:$12 sps:$4 sm:$0xff]   ;;  %v3369_v53 = vld [vmem:[#allocation4 + $0x110] ss:$12 sps:$4 sm:$0xff]  }
 0x127   :  { %v602_v12 = vmax.f32 %v414_v61, 0.0  ;;  %v604_v17 = vmax.f32 %v527_v62, 0.0  ;;  %v3720_v26 = vpack.c.bf16 %v601_v1, %v597_v18  ;;  %v3722_v27 = vpack.c.bf16 %v603_v0, %v599_v19  ;;  %v3370_v1 = vld [vmem:[#allocation4 + $0x50] ss:$12 sps:$4 sm:$0xff]  }
 0x128   :  { %v419_v20 = vpop.f32.mrf.mxu0  ;;  %v532_v21 = vpop.f32.mrf.mxu1  ;;  %v418_v37 = vadd.f32 %v417_v2, %v3682_v15  ;;  %v531_v38 = vadd.f32 %v530_v4, %v3686_v16  ;;  %v3371_v0 = vld [vmem:[#allocation4 + $0x290] ss:$12 sps:$4 sm:$0xff]  }
 0x129   :  { %v3716_v22 = vpack.c.bf16 %v602_v12, %v598_v10  ;;  %v3718_v23 = vpack.c.bf16 %v604_v17, %v600_v11  ;;  %2889 = vmatpush3.bf16.msra.mxu0 %v3358_v63  ;;  %v420_v28 = vadd.f32 %v419_v20, %v3676_v13  ;;  %2953 = vmatpush3.bf16.msra.mxu1 %v3360_v5  ;;  %v3372_v11 = vld [vmem:[#allocation4 + $0x1d0] ss:$12 sps:$4 sm:$0xff]   ;;  %v3373_v12 = vld [vmem:[#allocation4 + $0xf8] ss:$12 sps:$4 sm:$0xff]  }
 0x12a   :  { %v421_v29 = vpop.f32.mrf.mxu0  ;;  %v534_v30 = vpop.f32.mrf.mxu1  ;;  %2890 = vmatprep.subr.bf16.mxu0 %v3361_v8  ;;  %v533_v33 = vadd.f32 %v532_v21, %v3678_v14  ;;  %2954 = vmatprep.subr.bf16.mxu1 %v3363_v25  ;;  %v605_v58 = vmax.f32 %v418_v37, 0.0  ;;  %v607_v59 = vmax.f32 %v531_v38, 0.0  ;;  %v3375_v20 = vld [vmem:[#allocation4 + $0x278] ss:$12 sps:$4 sm:$0xff]   ;;  %v3377_v37 = vld [vmem:[#allocation4 + $0xe0] ss:$12 sps:$4 sm:$0xff]  }
 0x12b   :  { %v422_v34 = vadd.f32 %v421_v29, %v3682_v15  ;;  %v535_v35 = vadd.f32 %v534_v30, %v3686_v16  ;;  %1737 = vmatprep.mubr.bf16.mxu0 %v3716_v22  ;;  %1850 = vmatprep.mubr.bf16.mxu1 %v3718_v23  ;;  %v606_v54 = vmax.f32 %v420_v28, 0.0 }
 0x12c   :  { %v423_v39 = vpop.f32.mrf.mxu0  ;;  %v536_v40 = vpop.f32.mrf.mxu1  ;;  %1738 = vmatmul.mubr.bf16.gmra.mxu0 %v3720_v26  ;;  %1851 = vmatmul.mubr.bf16.gmra.mxu1 %v3722_v27  ;;  %v608_v55 = vmax.f32 %v533_v33, 0.0 }
 0x12d   :  { %v424_v41 = vadd.f32 %v423_v39, %v3676_v13  ;;  %v537_v42 = vadd.f32 %v536_v40, %v3678_v14  ;;  %2891 = vmatpush3.bf16.msra.mxu0 %v3362_v24  ;;  %v609_v46 = vmax.f32 %v422_v34, 0.0  ;;  %v611_v49 = vmax.f32 %v535_v35, 0.0  ;;  %2955 = vmatpush3.bf16.msra.mxu1 %v3364_v31  ;;  %v3374_v31 = vld [vmem:[#allocation4 + $0x38] ss:$12 sps:$4 sm:$0xff]  }
 0x12e   :  { %v427_v50 = vpop.f32.mrf.mxu0  ;;  %v540_v51 = vpop.f32.mrf.mxu1  ;;  %2892 = vmatprep.subr.bf16.mxu0 %v3365_v32  ;;  %2956 = vmatprep.subr.bf16.mxu1 %v3367_v36  ;;  %v3376_v36 = vld [vmem:[#allocation4 + $0x1b8] ss:$12 sps:$4 sm:$0xff]  }
 0x12f   :  { %v610_v56 = vmax.f32 %v424_v41, 0.0  ;;  %v612_v57 = vmax.f32 %v537_v42, 0.0  ;;  %v3740_v2 = vpack.c.bf16 %v609_v46, %v605_v58  ;;  %v3742_v4 = vpack.c.bf16 %v611_v49, %v607_v59  ;;  %v3380_v59 = vld [vmem:[#allocation4 + $0x1a0] ss:$12 sps:$4 sm:$0xff]  }
 0x130   :  { %v429_v60 = vpop.f32.mrf.mxu0  ;;  %v542_v61 = vpop.f32.mrf.mxu1  ;;  %v428_v21 = vadd.f32 %v427_v50, %v3682_v15  ;;  %v541_v24 = vadd.f32 %v540_v51, %v3686_v16 }
 0x131   :  { %v3736_v62 = vpack.c.bf16 %v610_v56, %v606_v54  ;;  %v3738_v63 = vpack.c.bf16 %v612_v57, %v608_v55  ;;  %2893 = vmatpush3.bf16.msra.mxu0 %v3366_v45  ;;  %v430_v5 = vadd.f32 %v429_v60, %v3676_v13  ;;  %2957 = vmatpush3.bf16.msra.mxu1 %v3368_v52  ;;  %v3378_v52 = vld [vmem:[#allocation4 + $0x20] ss:$12 sps:$4 sm:$0xff]   ;;  %v3381_v60 = vld [vmem:[#allocation4 + $0xc8] ss:$12 sps:$4 sm:$0xff]  }
 0x132   :  { %v431_v8 = vpop.f32.mrf.mxu0  ;;  %v544_v10 = vpop.f32.mrf.mxu1  ;;  %2894 = vmatprep.subr.bf16.mxu0 %v3369_v53  ;;  %v543_v17 = vadd.f32 %v542_v61, %v3678_v14  ;;  %2958 = vmatprep.subr.bf16.mxu1 %v3371_v0  ;;  %v613_v42 = vmax.f32 %v428_v21, 0.0  ;;  %v615_v45 = vmax.f32 %v541_v24, 0.0  ;;  %v3379_v53 = vld [vmem:[#allocation4 + $0x260] ss:$12 sps:$4 sm:$0xff]  }
 0x133   :  { %v432_v18 = vadd.f32 %v431_v8, %v3682_v15  ;;  %v545_v19 = vadd.f32 %v544_v10, %v3686_v16  ;;  %1747 = vmatprep.mubr.bf16.mxu0 %v3736_v62  ;;  %1860 = vmatprep.mubr.bf16.mxu1 %v3738_v63  ;;  %v614_v38 = vmax.f32 %v430_v5, 0.0  ;;  %v3383_v5 = vld [vmem:[#allocation4 + $0x248] ss:$12 sps:$4 sm:$0xff]  }
 0x134   :  { %v433_v25 = vpop.f32.mrf.mxu0  ;;  %v546_v28 = vpop.f32.mrf.mxu1  ;;  %1748 = vmatmul.mubr.bf16.gmra.mxu0 %v3740_v2  ;;  %1861 = vmatmul.mubr.bf16.gmra.mxu1 %v3742_v4  ;;  %v616_v39 = vmax.f32 %v543_v17, 0.0 }
 0x135   :  { %v434_v29 = vadd.f32 %v433_v25, %v3676_v13  ;;  %v547_v30 = vadd.f32 %v546_v28, %v3678_v14  ;;  %2895 = vmatpush3.bf16.msra.mxu0 %v3370_v1  ;;  %v617_v32 = vmax.f32 %v432_v18, 0.0  ;;  %v619_v33 = vmax.f32 %v545_v19, 0.0  ;;  %2959 = vmatpush3.bf16.msra.mxu1 %v3372_v11  ;;  %v3382_v19 = vld [vmem:[#allocation4 + $0x8] ss:$12 sps:$4 sm:$0xff]  }
 0x136   :  { %v437_v34 = vpop.f32.mrf.mxu0  ;;  %v550_v35 = vpop.f32.mrf.mxu1  ;;  %2896 = vmatprep.subr.bf16.mxu0 %v3373_v12  ;;  %2960 = vmatprep.subr.bf16.mxu1 %v3375_v20  ;;  %v3384_v28 = vld [vmem:[#allocation4 + $0x188] ss:$12 sps:$4 sm:$0xff]  }
 0x137   :  { %v618_v40 = vmax.f32 %v434_v29, 0.0  ;;  %v620_v41 = vmax.f32 %v547_v30, 0.0  ;;  %v3760_v54 = vpack.c.bf16 %v617_v32, %v613_v42  ;;  %v3762_v55 = vpack.c.bf16 %v619_v33, %v615_v45  ;;  %v3385_v29 = vld [vmem:[#allocation7 + $0x78] sm:$0xff]  }
 0x138   :  { %v439_v46 = vpop.f32.mrf.mxu0  ;;  %v552_v49 = vpop.f32.mrf.mxu1  ;;  %v438_v8 = vadd.f32 %v437_v34, %v3682_v15  ;;  %v551_v10 = vadd.f32 %v550_v35, %v3686_v16 }
 0x139   :  { %v3756_v50 = vpack.c.bf16 %v618_v40, %v614_v38  ;;  %v3758_v51 = vpack.c.bf16 %v620_v41, %v616_v39  ;;  %2897 = vmatpush3.bf16.msra.mxu0 %v3374_v31  ;;  %v440_v56 = vadd.f32 %v439_v46, %v3676_v13  ;;  %2961 = vmatpush3.bf16.msra.mxu1 %v3376_v36 }
 0x13a   :  { %v441_v57 = vpop.f32.mrf.mxu0  ;;  %v554_v58 = vpop.f32.mrf.mxu1  ;;  %2898 = vmatprep.subr.bf16.mxu0 %v3377_v37  ;;  %v553_v61 = vadd.f32 %v552_v49, %v3678_v14  ;;  %2962 = vmatprep.subr.bf16.mxu1 %v3379_v53  ;;  %v621_v34 = vmax.f32 %v438_v8, 0.0  ;;  %v623_v35 = vmax.f32 %v551_v10, 0.0 }
 0x13b   :  { %v442_v1 = vadd.f32 %v441_v57, %v3682_v15  ;;  %v555_v0 = vadd.f32 %v554_v58, %v3686_v16  ;;  %1757 = vmatprep.mubr.bf16.mxu0 %v3756_v50  ;;  %1870 = vmatprep.mubr.bf16.mxu1 %v3758_v51  ;;  %v622_v30 = vmax.f32 %v440_v56, 0.0 }
 0x13c   :  { %v443_v11 = vpop.f32.mrf.mxu0  ;;  %v556_v12 = vpop.f32.mrf.mxu1  ;;  %1758 = vmatmul.mubr.bf16.gmra.mxu0 %v3760_v54  ;;  %1871 = vmatmul.mubr.bf16.gmra.mxu1 %v3762_v55  ;;  %v624_v31 = vmax.f32 %v553_v61, 0.0 }
 0x13d   :  { %v444_v17 = vadd.f32 %v443_v11, %v3676_v13  ;;  %v557_v18 = vadd.f32 %v556_v12, %v3678_v14  ;;  %2899 = vmatpush3.bf16.msra.mxu0 %v3378_v52  ;;  %v625_v20 = vmax.f32 %v442_v1, 0.0  ;;  %v627_v21 = vmax.f32 %v555_v0, 0.0  ;;  %2963 = vmatpush3.bf16.msra.mxu1 %v3380_v59 }
 0x13e   :  { %v447_v24 = vpop.f32.mrf.mxu0  ;;  %v560_v25 = vpop.f32.mrf.mxu1  ;;  %2900 = vmatprep.subr.bf16.mxu0 %v3381_v60  ;;  %2964 = vmatprep.subr.bf16.mxu1 %v3383_v5 }
 0x13f   :  { %v626_v32 = vmax.f32 %v444_v17, 0.0  ;;  %v628_v33 = vmax.f32 %v557_v18, 0.0  ;;  %v3780_v40 = vpack.c.bf16 %v625_v20, %v621_v34  ;;  %v3782_v41 = vpack.c.bf16 %v627_v21, %v623_v35 }
 0x140   :  { %v449_v36 = vpop.f32.mrf.mxu0  ;;  %v562_v37 = vpop.f32.mrf.mxu1  ;;  %v448_v56 = vadd.f32 %v447_v24, %v3682_v15  ;;  %v561_v57 = vadd.f32 %v560_v25, %v3686_v16 }
 0x141   :  { %v3776_v38 = vpack.c.bf16 %v628_v33, %v624_v31  ;;  %v3778_v39 = vpack.c.bf16 %v626_v32, %v622_v30  ;;  %2901 = vmatpush3.bf16.msra.mxu0 %v3382_v19  ;;  %v450_v42 = vadd.f32 %v449_v36, %v3676_v13  ;;  %2965 = vmatpush3.bf16.msra.mxu1 %v3384_v28 }
 0x142   :  { %v451_v45 = vpop.f32.mrf.mxu0  ;;  %v564_v46 = vpop.f32.mrf.mxu1  ;;  %3014 = vmatprep.subr.bf16.mxu0 %v3385_v29  ;;  %v563_v49 = vadd.f32 %v562_v37, %v3678_v14  ;;  %v629_v18 = vmax.f32 %v448_v56, 0.0  ;;  %v631_v19 = vmax.f32 %v561_v57, 0.0 }
 0x143   :  { %v452_v52 = vadd.f32 %v451_v45, %v3682_v15  ;;  %v565_v53 = vadd.f32 %v564_v46, %v3686_v16  ;;  %1767 = vmatprep.mubr.bf16.mxu0 %v3778_v39  ;;  %1880 = vmatprep.mubr.bf16.mxu1 %v3776_v38  ;;  %v630_v10 = vmax.f32 %v450_v42, 0.0 }
 0x144   :  { %v453_v58 = vpop.f32.mrf.mxu0  ;;  %v566_v59 = vpop.f32.mrf.mxu1  ;;  %1768 = vmatmul.mubr.bf16.gmra.mxu0 %v3780_v40  ;;  %1881 = vmatmul.mubr.bf16.gmra.mxu1 %v3782_v41  ;;  %v632_v11 = vmax.f32 %v563_v49, 0.0 }
 0x145   :  { %v454_v60 = vadd.f32 %v453_v58, %v3676_v13  ;;  %v567_v61 = vadd.f32 %v566_v59, %v3678_v14  ;;  %v633_v1 = vmax.f32 %v452_v52, 0.0  ;;  %v635_v0 = vmax.f32 %v565_v53, 0.0 }
 0x146   :  { %v457_v5 = vpop.f32.mrf.mxu0  ;;  %v570_v8 = vpop.f32.mrf.mxu1 }
 0x147   :  { %v634_v12 = vmax.f32 %v454_v60, 0.0  ;;  %v636_v17 = vmax.f32 %v567_v61, 0.0  ;;  %v3800_v28 = vpack.c.bf16 %v633_v1, %v629_v18  ;;  %v3802_v29 = vpack.c.bf16 %v635_v0, %v631_v19 }
 0x148   :  { %v459_v20 = vpop.f32.mrf.mxu0  ;;  %v572_v21 = vpop.f32.mrf.mxu1  ;;  %v458_v36 = vadd.f32 %v457_v5, %v3682_v15  ;;  %v571_v37 = vadd.f32 %v570_v8, %v3686_v16 }
 0x149   :  { %v3796_v24 = vpack.c.bf16 %v636_v17, %v632_v11  ;;  %v3798_v25 = vpack.c.bf16 %v634_v12, %v630_v10  ;;  %v460_v30 = vadd.f32 %v459_v20, %v3676_v13  ;;  %v573_v33 = vadd.f32 %v572_v21, %v3678_v14 }
 0x14a   :  { %v461_v31 = vpop.f32.mrf.mxu0  ;;  %v574_v32 = vpop.f32.mrf.mxu1  ;;  %v637_v1 = vmax.f32 %v458_v36, 0.0  ;;  %v639_v0 = vmax.f32 %v571_v37, 0.0 }
 0x14b   :  { %v462_v34 = vadd.f32 %v461_v31, %v3682_v15  ;;  %v575_v35 = vadd.f32 %v574_v32, %v3686_v16  ;;  %1777 = vmatprep.mubr.bf16.mxu0 %v3798_v25  ;;  %1890 = vmatprep.mubr.bf16.mxu1 %v3796_v24  ;;  %v638_v58 = vmax.f32 %v460_v30, 0.0  ;;  %v640_v59 = vmax.f32 %v573_v33, 0.0 }
 0x14c   :  { %v463_v42 = vpop.f32.mrf.mxu0  ;;  %v576_v45 = vpop.f32.mrf.mxu1  ;;  %1778 = vmatmul.mubr.bf16.gmra.mxu0 %v3800_v28  ;;  %1891 = vmatmul.mubr.bf16.gmra.mxu1 %v3802_v29 }
 0x14d   :  { %v464_v46 = vadd.f32 %v463_v42, %v3676_v13  ;;  %v577_v49 = vadd.f32 %v576_v45, %v3678_v14  ;;  %v641_v52 = vmax.f32 %v462_v34, 0.0  ;;  %v643_v53 = vmax.f32 %v575_v35, 0.0 }
 0x14e   :  { %v467_v56 = vpop.f32.mrf.mxu0  ;;  %v580_v57 = vpop.f32.mrf.mxu1 }
 0x14f   :  { %v642_v60 = vmax.f32 %v464_v46, 0.0  ;;  %v644_v61 = vmax.f32 %v577_v49, 0.0  ;;  %v3820_v12 = vpack.c.bf16 %v641_v52, %v637_v1  ;;  %v3822_v17 = vpack.c.bf16 %v643_v53, %v639_v0  ;;  %v3389_v1 = vld [vmem:[#allocation7 + $0x68] sm:$0xff]  }
 0x150   :  { %v469_v5 = vpop.f32.mrf.mxu0  ;;  %v582_v8 = vpop.f32.mrf.mxu1  ;;  %v468_v32 = vadd.f32 %v467_v56, %v3682_v15  ;;  %v581_v33 = vadd.f32 %v580_v57, %v3686_v16 }
 0x151   :  { %v3816_v10 = vpack.c.bf16 %v644_v61, %v640_v59  ;;  %v3818_v11 = vpack.c.bf16 %v642_v60, %v638_v58  ;;  %v470_v18 = vadd.f32 %v469_v5, %v3676_v13  ;;  %v583_v21 = vadd.f32 %v582_v8, %v3678_v14  ;;  %v3388_v61 = vld [vmem:[#allocation7 + $0x30] sm:$0xff]   ;;  %v3394_v5 = vld [vmem:[#allocation7 + $0x18] sm:$0xff]  }
 0x152   :  { %v471_v19 = vpop.f32.mrf.mxu0  ;;  %v584_v20 = vpop.f32.mrf.mxu1  ;;  %v645_v58 = vmax.f32 %v468_v32, 0.0  ;;  %v3395_v8 = vld [vmem:[#allocation7 + $0x50] sm:$0xff]  }
 0x153   :  { %v472_v30 = vadd.f32 %v471_v19, %v3682_v15  ;;  %v585_v31 = vadd.f32 %v584_v20, %v3686_v16  ;;  %1787 = vmatprep.mubr.bf16.mxu0 %v3818_v11  ;;  %1900 = vmatprep.mubr.bf16.mxu1 %v3816_v10  ;;  %v646_v46 = vmax.f32 %v470_v18, 0.0  ;;  %v648_v49 = vmax.f32 %v583_v21, 0.0  ;;  %v3398_v18 = vld [vmem:[#allocation7 + $0x8] sm:$0xff]   ;;  %v3399_v19 = vld [vmem:[#allocation7 + $0x40] sm:$0xff]  }
 0x154   :  { %v473_v34 = vpop.f32.mrf.mxu0  ;;  %v586_v35 = vpop.f32.mrf.mxu1  ;;  %1788 = vmatmul.mubr.bf16.gmra.mxu0 %v3820_v12  ;;  %1901 = vmatmul.mubr.bf16.gmra.mxu1 %v3822_v17  ;;  %v647_v15 = vmax.f32 %v581_v33, 0.0 }
 0x155   :  { %v474_v36 = vadd.f32 %v473_v34, %v3676_v13  ;;  %v587_v37 = vadd.f32 %v586_v35, %v3678_v14  ;;  %v649_v42 = vmax.f32 %v472_v30, 0.0  ;;  %v651_v45 = vmax.f32 %v585_v31, 0.0  ;;  %v3386_v13 = vld [vmem:[#allocation7 + $0x38] sm:$0xff]   ;;  %v3387_v14 = vld [vmem:[#allocation7 + $0x70] sm:$0xff]  }
 0x156   :  { %v3854_v60 = vpop.f32.mrf.mxu0  ;;  %v3406_v31 = vld [vmem:[#allocation7 + $0x90] sm:$0xff]  }
 0x157   :  { %v650_v52 = vmax.f32 %v474_v36, 0.0  ;;  %v652_v53 = vmax.f32 %v587_v37, 0.0  ;;  %v3840_v57 = vpack.c.bf16 %v649_v42, %v645_v58  ;;  %v3842_v59 = vpack.c.bf16 %v651_v45, %v647_v15  ;;  %v3407_v37 = vld [vmem:[#allocation7 + $0x88] sm:$0xff]  }
 0x158   :  { %v3856_v0 = vpop.f32.mrf.mxu0 }
 0x159   :  { %v3836_v56 = vpack.c.bf16 %v652_v53, %v648_v49  ;;  %v3838_v16 = vpack.c.bf16 %v650_v52, %v646_v46  ;;  %v3408_v46 = vld [vmem:[#allocation7 + $0x80] sm:$0xff]  }
 0x15b   :  { %1797 = vmatprep.mubr.bf16.mxu0 %v3838_v16  ;;  %1910 = vmatprep.mubr.bf16.mxu1 %v3836_v56 }
 0x15c   :  { %1798 = vmatmul.mubr.bf16.gmra.mxu0 %v3840_v57  ;;  %1911 = vmatmul.mubr.bf16.gmra.mxu1 %v3842_v59 }
 0x15d   :  { %1953 = vmatprep.mubr.bf16.mxu0 %v3696_v43  ;;  %2050 = vmatprep.mubr.bf16.mxu1 %v3698_v44  ;;  %v3390_v43 = vld [vmem:[#allocation7 + $0x28] sm:$0xff]   ;;  %v3391_v44 = vld [vmem:[#allocation7 + $0x60] sm:$0xff]  }
 0x164   :  { %1954 = vmatmul.mubr.bf16.vlgmr.msra.gmra.mxu0 %v3700_v47  ;;  %2051 = vmatmul.mubr.bf16.vlgmr.msra.gmra.mxu1 %v3702_v48  ;;  %v3862_v47 = vpop.f32.mrf.mxu0  ;;  %v3392_v48 = vld [vmem:[#allocation7 + $0x20] sm:$0xff]  }
 0x165   :  { %1961 = vmatprep.mubr.bf16.mxu0 %v3716_v22  ;;  %2058 = vmatprep.mubr.bf16.mxu1 %v3718_v23  ;;  %v3393_v22 = vld [vmem:[#allocation7 + $0x58] sm:$0xff]  }
 0x166   :  { %3015 = vmatpush3.bf16.msra.mxu0 %v3386_v13  ;;  %v3864_v23 = vpop.f32.mrf.mxu0 }
 0x167   :  { %3016 = vmatprep.subr.bf16.mxu0 %v3387_v14 }
 0x16a   :  { %3017 = vmatpush3.bf16.msra.mxu0 %v3388_v61 }
 0x16b   :  { %3018 = vmatprep.subr.bf16.mxu0 %v3389_v1 }
 0x16c   :  { %1962 = vmatmul.mubr.bf16.gmra.mxu0 %v3720_v26  ;;  %2059 = vmatmul.mubr.bf16.gmra.mxu1 %v3722_v27  ;;  %v3870_v26 = vpop.f32.mrf.mxu0  ;;  %v3396_v27 = vld [vmem:[#allocation7 + $0x10] sm:$0xff]  }
 0x16d   :  { %1969 = vmatprep.mubr.bf16.mxu0 %v3736_v62  ;;  %2066 = vmatprep.mubr.bf16.mxu1 %v3738_v63  ;;  %v3397_v62 = vld [vmem:[#allocation7 + $0x48] sm:$0xff]  }
 0x16e   :  { %3019 = vmatpush3.bf16.msra.mxu0 %v3390_v43  ;;  %v3872_v63 = vpop.f32.mrf.mxu0 }
 0x16f   :  { %3020 = vmatprep.subr.bf16.mxu0 %v3391_v44 }
 0x172   :  { %3021 = vmatpush3.bf16.msra.mxu0 %v3392_v48 }
 0x173   :  { %3022 = vmatprep.subr.bf16.mxu0 %v3393_v22 }
 0x174   :  { %1970 = vmatmul.mubr.bf16.gmra.mxu0 %v3740_v2  ;;  %2067 = vmatmul.mubr.bf16.gmra.mxu1 %v3742_v4  ;;  %v3878_v2 = vpop.f32.mrf.mxu0  ;;  %v3400_v4 = vld [vmem:[#allocation7] sm:$0xff]  }
 0x175   :  { %1977 = vmatprep.mubr.bf16.mxu0 %v3756_v50  ;;  %2074 = vmatprep.mubr.bf16.mxu1 %v3758_v51  ;;  %v3401_v51 = vld [vmem:[#allocation7 + $0xb8] sm:$0xff]  }
 0x176   :  { %3023 = vmatpush3.bf16.msra.mxu0 %v3394_v5  ;;  %v3880_v50 = vpop.f32.mrf.mxu0  ;;  %3126 = vmatprep.subr.bf16.mxu1 %v3401_v51 }
 0x177   :  { %3024 = vmatprep.subr.bf16.mxu0 %v3395_v8  ;;  %3127 = vmatpush3.bf16.msra.mxu1 %v3401_v51 }
 0x17a   :  { %3025 = vmatpush3.bf16.msra.mxu0 %v3396_v27 }
 0x17b   :  { %3026 = vmatprep.subr.bf16.mxu0 %v3397_v62 }
 0x17c   :  { %1978 = vmatmul.mubr.bf16.gmra.mxu0 %v3760_v54  ;;  %2075 = vmatmul.mubr.bf16.gmra.mxu1 %v3762_v55  ;;  %v3886_v54 = vpop.f32.mrf.mxu0 }
 0x17d   :  { %1985 = vmatprep.mubr.bf16.mxu0 %v3778_v39  ;;  %2082 = vmatprep.mubr.bf16.mxu1 %v3776_v38  ;;  %v3402_v38 = vld [vmem:[#allocation7 + $0xb0] sm:$0xff]  }
 0x17e   :  { %3027 = vmatpush3.bf16.msra.mxu0 %v3398_v18  ;;  %v3888_v55 = vpop.f32.mrf.mxu0  ;;  %3128 = vmatprep.subr.bf16.mxu1 %v3402_v38 }
 0x17f   :  { %3028 = vmatprep.subr.bf16.mxu0 %v3399_v19  ;;  %3129 = vmatpush3.bf16.msra.mxu1 %v3402_v38  ;;  %v3980_v38 = vld [vmem:[%s4121_s5] sm:$0x7] }
 0x180   :  { %v3894_v39 = vpop.f32.mrf.mxu0 }
 0x182   :  { %3029 = vmatpush3.bf16.msra.mxu0 %v3400_v4 }
 0x184   :  { %1986 = vmatmul.mubr.bf16.gmra.mxu0 %v3780_v40  ;;  %2083 = vmatmul.mubr.bf16.gmra.mxu1 %v3782_v41  ;;  %v3896_v40 = vpop.f32.mrf.mxu0  ;;  %v3403_v41 = vld [vmem:[#allocation7 + $0xa8] sm:$0xff]  }
 0x185   :  { %1993 = vmatprep.mubr.bf16.mxu0 %v3798_v25  ;;  %2090 = vmatprep.mubr.bf16.mxu1 %v3796_v24 }
 0x186   :  { %v3902_v24 = vpop.f32.mrf.mxu0  ;;  %3130 = vmatprep.subr.bf16.mxu1 %v3403_v41 }
 0x187   :  { %3131 = vmatpush3.bf16.msra.mxu1 %v3403_v41 }
 0x188   :  { %v3904_v25 = vpop.f32.mrf.mxu0 }
 0x18c   :  { %1994 = vmatmul.mubr.bf16.gmra.mxu0 %v3800_v28  ;;  %2091 = vmatmul.mubr.bf16.gmra.mxu1 %v3802_v29  ;;  %v3404_v28 = vld [vmem:[#allocation7 + $0xa0] sm:$0xff]   ;;  %v3908_v29 = vpop.f32.mrf.mxu0 }
 0x18d   :  { %2001 = vmatprep.mubr.bf16.mxu0 %v3818_v11  ;;  %2098 = vmatprep.mubr.bf16.mxu1 %v3816_v10  ;;  %v3405_v11 = vld [vmem:[#allocation7 + $0x98] sm:$0xff]  }
 0x18e   :  { %3132 = vmatprep.subr.bf16.mxu1 %v3404_v28  ;;  %v3910_v10 = vpop.f32.mrf.mxu0 }
 0x18f   :  { %3133 = vmatpush3.bf16.msra.mxu1 %v3404_v28 }
 0x190   :  { %3134 = vmatprep.subr.bf16.mxu1 %v3405_v11 }
 0x193   :  { %3135 = vmatpush3.bf16.msra.mxu1 %v3405_v11 }
 0x194   :  { %2002 = vmatmul.mubr.bf16.gmra.mxu0 %v3820_v12  ;;  %2099 = vmatmul.mubr.bf16.gmra.mxu1 %v3822_v17  ;;  %v3912_v12 = vpop.f32.mrf.mxu0  ;;  %v3914_v17 = vpop.f32.mrf.mxu1 }
 0x195   :  { %2009 = vmatprep.mubr.bf16.mxu0 %v3838_v16  ;;  %2106 = vmatprep.mubr.bf16.mxu1 %v3836_v56 }
 0x196   :  { %v3916_v20 = vpop.f32.mrf.mxu0  ;;  %v3918_v21 = vpop.f32.mrf.mxu1  ;;  %3136 = vmatprep.subr.bf16.mxu1 %v3406_v31 }
 0x197   :  { %3137 = vmatpush3.bf16.msra.mxu1 %v3406_v31 }
 0x198   :  { %v3920_v30 = vpop.f32.mrf.mxu0  ;;  %v3922_v32 = vpop.f32.mrf.mxu1  ;;  %3138 = vmatprep.subr.bf16.mxu1 %v3407_v37 }
 0x19a   :  { %v3924_v33 = vpop.f32.mrf.mxu0  ;;  %v3926_v34 = vpop.f32.mrf.mxu1 }
 0x19b   :  { %3139 = vmatpush3.bf16.msra.mxu1 %v3407_v37  ;;  %v3986_v37 = vrot.slane %v3980_v38, %v141_v7 }
 0x19c   :  { %2010 = vmatmul.mubr.bf16.gmra.mxu0 %v3840_v57  ;;  %2107 = vmatmul.mubr.bf16.gmra.mxu1 %v3842_v59  ;;  %v3928_v35 = vpop.f32.mrf.mxu0  ;;  %v3930_v36 = vpop.f32.mrf.mxu1 }
 0x19d   :  { %3140 = vmatprep.subr.bf16.mxu1 %v3408_v46 }
 0x19e   :  { %v3932_v42 = vpop.f32.mrf.mxu0  ;;  %v3934_v45 = vpop.f32.mrf.mxu1 }
 0x19f   :  { %3141 = vmatpush3.bf16.msra.mxu1 %v3408_v46 }
 0x1a0   :  { %v3936_v49 = vpop.f32.mrf.mxu0  ;;  %v3938_v52 = vpop.f32.mrf.mxu1 }
 0x1a1   :  { %4126 = vst [vmem:[#allocation12_spill] sm:$0xff] %v3938_v52 }
 0x1a2   :  { %v3940_v53 = vpop.f32.mrf.mxu0  ;;  %v3942_v58 = vpop.f32.mrf.mxu1 }
 0x1a4   :  { %v3944_v15 = vpop.f32.mrf.mxu0  ;;  %v3946_v56 = vpop.f32.mrf.mxu1 }
 0x1a5   :  { %4127 = vst [vmem:[#allocation13_spill] sm:$0xff] %v3946_v56 }
 0x1a6   :  { %v3948_v16 = vpop.f32.mrf.mxu0  ;;  %v3950_v57 = vpop.f32.mrf.mxu1 }
 0x1a7   :  { %4128 = vst [vmem:[#allocation14_spill] sm:$0xff] %v3950_v57 }
 0x1a8   :  { %v3952_v59 = vpop.f32.mrf.mxu0  ;;  %v3954_v13 = vpop.f32.mrf.mxu1 }
 0x1a9   :  { %4129 = vst [vmem:[#allocation15_spill] sm:$0xff] %v3954_v13 }
 0x1aa   :  { %v3956_v14 = vpop.f32.mrf.mxu0  ;;  %v3958_v61 = vpop.f32.mrf.mxu1 }
 0x1ab   :  { %4130 = vst [vmem:[#allocation16_spill] sm:$0xff] %v3958_v61 }
 0x1ac   :  { %v3960_v1 = vpop.f32.mrf.mxu0  ;;  %v3962_v43 = vpop.f32.mrf.mxu1 }
 0x1ad   :  { %4131 = vst [vmem:[#allocation17_spill] sm:$0xff] %v3962_v43 }
 0x1ae   :  { %v3964_v44 = vpop.f32.mrf.mxu0  ;;  %v3966_v48 = vpop.f32.mrf.mxu1 }
 0x1af   :  { %4132 = vst [vmem:[#allocation18_spill] sm:$0xff] %v3966_v48 }
 0x1b0   :  { %v3968_v22 = vpop.f32.mrf.mxu0  ;;  %v3970_v5 = vpop.f32.mrf.mxu1 }
 0x1b1   :  { %4133 = vst [vmem:[#allocation19_spill] sm:$0xff] %v3970_v5 }
 0x1b2   :  { %v3972_v8 = vpop.f32.mrf.mxu0  ;;  %v3974_v27 = vpop.f32.mrf.mxu1 }
 0x1b3   :  { %4134 = vst [vmem:[#allocation20_spill] sm:$0xff] %v3974_v27 }
 0x1e4   :  { %v1729_v62 = vpop.f32.mrf.mxu0  ;;  %v1842_v18 = vpop.f32.mrf.mxu1 }
 0x1e5   :  { %v1730_v19 = vadd.f32 %v1729_v62, %v3854_v60  ;;  %v3992_v62 = vrot.slane %v3980_v38, %v137_v3 }
 0x1e6   :  { %v1731_v4 = vpop.f32.mrf.mxu0  ;;  %v1844_v51 = vpop.f32.mrf.mxu1 }
 0x1e7   :  { %v1732_v41 = vadd.f32 %v1731_v4, %v3856_v0  ;;  %v1843_v60 = vadd.f32 %v1842_v18, %v1730_v19 }
 0x1e8   :  { %v1733_v28 = vpop.f32.mrf.mxu0  ;;  %v1846_v11 = vpop.f32.mrf.mxu1 }
 0x1e9   :  { %v1845_v31 = vadd.f32 %v1844_v51, %v1732_v41  ;;  %v1734_v46 = vadd.f32 %v1733_v28, %v3862_v47  ;;  %v2132_v47 = vadd.f32 %v3992_v62, %v1843_v60 }
 0x1ea   :  { %v1735_v9 = vpop.f32.mrf.mxu0  ;;  %v1848_v5 = vpop.f32.mrf.mxu1 }
 0x1eb   :  { %v1847_v43 = vadd.f32 %v1846_v11, %v1734_v46  ;;  %v1736_v0 = vadd.f32 %v1735_v9, %v3864_v23  ;;  %v2133_v41 = vadd.f32 %v3986_v37, %v1845_v31  ;;  %v2180_v56 = vmax.f32 %v2132_v47, 0.0 }
 0x1ec   :  { %v1739_v4 = vpop.f32.mrf.mxu0  ;;  %v1852_v51 = vpop.f32.mrf.mxu1 }
 0x1ed   :  { %v2135_v7 = vadd.f32 %v3992_v62, %v1847_v43  ;;  %v1849_v27 = vadd.f32 %v1848_v5, %v1736_v0  ;;  %v1740_v3 = vadd.f32 %v1739_v4, %v3870_v26  ;;  %v2181_v23 = vmax.f32 %v2133_v41, 0.0 }
 0x1ee   :  { %v1741_v18 = vpop.f32.mrf.mxu0  ;;  %v1854_v19 = vpop.f32.mrf.mxu1 }
 0x1ef   :  { %v2136_v28 = vadd.f32 %v3986_v37, %v1849_v27  ;;  %v1742_v48 = vadd.f32 %v1741_v18, %v3872_v63  ;;  %v2183_v11 = vmax.f32 %v2135_v7, 0.0  ;;  %v1853_v60 = vadd.f32 %v1852_v51, %v1740_v3 }
 0x1f0   :  { %v1743_v46 = vpop.f32.mrf.mxu0  ;;  %v1856_v9 = vpop.f32.mrf.mxu1 }
 0x1f1   :  { %v2184_v13 = vmax.f32 %v2136_v28, 0.0  ;;  %v1855_v31 = vadd.f32 %v1854_v19, %v1742_v48  ;;  %v1744_v43 = vadd.f32 %v1743_v46, %v3878_v2  ;;  %v2228_v27 = vpack.c.bf16 %v2183_v11, %v2180_v56 }
 0x1f2   :  { %v1745_v5 = vpop.f32.mrf.mxu0  ;;  %v1858_v0 = vpop.f32.mrf.mxu1  ;;  %v2138_v2 = vadd.f32 %v3992_v62, %v1853_v60 }
 0x1f3   :  { %v1746_v61 = vadd.f32 %v1745_v5, %v3880_v50  ;;  %v2229_v57 = vpack.c.bf16 %v2184_v13, %v2181_v23  ;;  %v1857_v52 = vadd.f32 %v1856_v9, %v1744_v43  ;;  %v2139_v7 = vadd.f32 %v3986_v37, %v1855_v31 }
 0x1f4   :  { %v1749_v26 = vpop.f32.mrf.mxu0  ;;  %v1862_v4 = vpop.f32.mrf.mxu1  ;;  %v2186_v46 = vmax.f32 %v2138_v2, 0.0 }
 0x1f5   :  { %v1859_v63 = vadd.f32 %v1858_v0, %v1746_v61  ;;  %2483 = vmatprep.mubr.bf16.mxu0 %v2229_v57  ;;  %v2141_v41 = vadd.f32 %v3992_v62, %v1857_v52  ;;  %v1750_v50 = vadd.f32 %v1749_v26, %v3886_v54  ;;  %v2187_v3 = vmax.f32 %v2139_v7, 0.0 }
 0x1f6   :  { %v1751_v47 = vpop.f32.mrf.mxu0  ;;  %v1864_v48 = vpop.f32.mrf.mxu1  ;;  %2484 = vmatmul.mubr.bf16.vlgmr.msra.gmra.mxu0 %v2228_v27 }
 0x1f7   :  { %v2142_v51 = vadd.f32 %v3986_v37, %v1859_v63  ;;  %v1752_v56 = vadd.f32 %v1751_v47, %v3888_v55  ;;  %v2189_v19 = vmax.f32 %v2141_v41, 0.0  ;;  %v1863_v9 = vadd.f32 %v1862_v4, %v1750_v50 }
 0x1f8   :  { %v1753_v13 = vpop.f32.mrf.mxu0  ;;  %v1866_v18 = vpop.f32.mrf.mxu1 }
 0x1f9   :  { %v2190_v61 = vmax.f32 %v2142_v51, 0.0  ;;  %v1865_v57 = vadd.f32 %v1864_v48, %v1752_v56  ;;  %v1754_v28 = vadd.f32 %v1753_v13, %v3894_v39  ;;  %v2231_v0 = vpack.c.bf16 %v2189_v19, %v2186_v46 }
 0x1fa   :  { %v1755_v52 = vpop.f32.mrf.mxu0  ;;  %v1868_v11 = vpop.f32.mrf.mxu1  ;;  %v2144_v63 = vadd.f32 %v3992_v62, %v1863_v9 }
 0x1fb   :  { %v1867_v23 = vadd.f32 %v1866_v18, %v1754_v28  ;;  %v1756_v31 = vadd.f32 %v1755_v52, %v3896_v40  ;;  %v2232_v54 = vpack.c.bf16 %v2190_v61, %v2187_v3  ;;  %v2145_v55 = vadd.f32 %v3986_v37, %v1865_v57 }
 0x1fc   :  { %v1759_v43 = vpop.f32.mrf.mxu0  ;;  %v1872_v5 = vpop.f32.mrf.mxu1  ;;  %v2192_v19 = vmax.f32 %v2144_v63, 0.0 }
 0x1fd   :  { %v2147_v60 = vadd.f32 %v3992_v62, %v1867_v23  ;;  %v1869_v27 = vadd.f32 %v1868_v11, %v1756_v31  ;;  %2491 = vmatprep.mubr.bf16.mxu0 %v2232_v54  ;;  %v1760_v4 = vadd.f32 %v1759_v43, %v3902_v24  ;;  %v2193_v48 = vmax.f32 %v2145_v55, 0.0 }
 0x1fe   :  { %v1761_v26 = vpop.f32.mrf.mxu0  ;;  %v1874_v39 = vpop.f32.mrf.mxu1  ;;  %2492 = vmatmul.mubr.bf16.gmra.mxu0 %v2231_v0 }
 0x1ff   :  { %v2148_v7 = vadd.f32 %v3986_v37, %v1869_v27  ;;  %v1762_v40 = vadd.f32 %v1761_v26, %v3904_v25  ;;  %v2195_v2 = vmax.f32 %v2147_v60, 0.0  ;;  %v1873_v61 = vadd.f32 %v1872_v5, %v1760_v4 }
 0x200   :  { %v1763_v41 = vpop.f32.mrf.mxu0  ;;  %v1876_v47 = vpop.f32.mrf.mxu1 }
 0x201   :  { %v2196_v51 = vmax.f32 %v2148_v7, 0.0  ;;  %v1875_v50 = vadd.f32 %v1874_v39, %v1762_v40  ;;  %v1764_v56 = vadd.f32 %v1763_v41, %v3908_v29  ;;  %v2234_v25 = vpack.c.bf16 %v2195_v2, %v2192_v19 }
 0x202   :  { %v1765_v13 = vpop.f32.mrf.mxu0  ;;  %v1878_v18 = vpop.f32.mrf.mxu1  ;;  %v2150_v29 = vadd.f32 %v3992_v62, %v1873_v61 }
 0x203   :  { %v1766_v57 = vadd.f32 %v1765_v13, %v3910_v10  ;;  %v2235_v28 = vpack.c.bf16 %v2196_v51, %v2193_v48  ;;  %v1877_v3 = vadd.f32 %v1876_v47, %v1764_v56  ;;  %v2151_v46 = vadd.f32 %v3986_v37, %v1875_v50 }
 0x204   :  { %v1769_v24 = vpop.f32.mrf.mxu0  ;;  %v1882_v52 = vpop.f32.mrf.mxu1  ;;  %v2198_v4 = vmax.f32 %v2150_v29, 0.0 }
 0x205   :  { %v1879_v11 = vadd.f32 %v1878_v18, %v1766_v57  ;;  %2499 = vmatprep.mubr.bf16.mxu0 %v2235_v28  ;;  %v2153_v9 = vadd.f32 %v3992_v62, %v1877_v3  ;;  %v1770_v5 = vadd.f32 %v1769_v24, %v3912_v12  ;;  %v2199_v39 = vmax.f32 %v2151_v46, 0.0 }
 0x206   :  { %v1771_v23 = vpop.f32.mrf.mxu0  ;;  %v1884_v31 = vpop.f32.mrf.mxu1  ;;  %2500 = vmatmul.mubr.bf16.gmra.mxu0 %v2234_v25 }
 0x207   :  { %v2154_v43 = vadd.f32 %v3986_v37, %v1879_v11  ;;  %v1772_v10 = vadd.f32 %v1771_v23, %v3916_v20  ;;  %v2201_v55 = vmax.f32 %v2153_v9, 0.0  ;;  %v1883_v40 = vadd.f32 %v1882_v52, %v1770_v5 }
 0x208   :  { %v1773_v54 = vpop.f32.mrf.mxu0  ;;  %v1886_v0 = vpop.f32.mrf.mxu1 }
 0x209   :  { %v2202_v60 = vmax.f32 %v2154_v43, 0.0  ;;  %v1885_v27 = vadd.f32 %v1884_v31, %v1772_v10  ;;  %v1774_v26 = vadd.f32 %v1773_v54, %v3920_v30  ;;  %v2237_v20 = vpack.c.bf16 %v2201_v55, %v2198_v4 }
 0x20a   :  { %v1775_v63 = vpop.f32.mrf.mxu0  ;;  %v1888_v7 = vpop.f32.mrf.mxu1  ;;  %v2156_v18 = vadd.f32 %v3992_v62, %v1883_v40 }
 0x20b   :  { %v1887_v41 = vadd.f32 %v1886_v0, %v1774_v26  ;;  %v1776_v47 = vadd.f32 %v1775_v63, %v3924_v33  ;;  %v2238_v2 = vpack.c.bf16 %v2202_v60, %v2199_v39  ;;  %v2157_v51 = vadd.f32 %v3986_v37, %v1885_v27 }
 0x20c   :  { %v1779_v48 = vpop.f32.mrf.mxu0  ;;  %v1892_v12 = vpop.f32.mrf.mxu1  ;;  %v2204_v23 = vmax.f32 %v2156_v18, 0.0 }
 0x20d   :  { %v2159_v50 = vadd.f32 %v3992_v62, %v1887_v41  ;;  %v1889_v56 = vadd.f32 %v1888_v7, %v1776_v47  ;;  %2507 = vmatprep.mubr.bf16.mxu0 %v2238_v2  ;;  %v1780_v61 = vadd.f32 %v1779_v48, %v3928_v35  ;;  %v2205_v3 = vmax.f32 %v2157_v51, 0.0 }
 0x20e   :  { %v1781_v13 = vpop.f32.mrf.mxu0  ;;  %v1894_v30 = vpop.f32.mrf.mxu1  ;;  %2508 = vmatmul.mubr.bf16.gmra.mxu0 %v2237_v20 }
 0x20f   :  { %v2160_v19 = vadd.f32 %v3986_v37, %v1889_v56  ;;  %v1782_v33 = vadd.f32 %v1781_v13, %v3932_v42  ;;  %v2207_v24 = vmax.f32 %v2159_v50, 0.0  ;;  %v1893_v31 = vadd.f32 %v1892_v12, %v1780_v61 }
 0x210   :  { %v1783_v57 = vpop.f32.mrf.mxu0  ;;  %v1896_v28 = vpop.f32.mrf.mxu1 }
 0x211   :  { %v2208_v52 = vmax.f32 %v2160_v19, 0.0  ;;  %v1895_v25 = vadd.f32 %v1894_v30, %v1782_v33  ;;  %v1784_v11 = vadd.f32 %v1783_v57, %v3936_v49  ;;  %v2240_v42 = vpack.c.bf16 %v2207_v24, %v2204_v23 }
 0x212   :  { %v1785_v46 = vpop.f32.mrf.mxu0  ;;  %v1898_v9 = vpop.f32.mrf.mxu1  ;;  %v2162_v49 = vadd.f32 %v3992_v62, %v1893_v31 }
 0x213   :  { %v1786_v29 = vadd.f32 %v1785_v46, %v3940_v53  ;;  %v2241_v43 = vpack.c.bf16 %v2208_v52, %v2205_v3  ;;  %v1897_v5 = vadd.f32 %v1896_v28, %v1784_v11  ;;  %v2163_v0 = vadd.f32 %v3986_v37, %v1895_v25 }
 0x214   :  { %v1789_v35 = vpop.f32.mrf.mxu0  ;;  %v1902_v10 = vpop.f32.mrf.mxu1  ;;  %v2210_v20 = vmax.f32 %v2162_v49, 0.0 }
 0x215   :  { %v1899_v54 = vadd.f32 %v1898_v9, %v1786_v29  ;;  %2515 = vmatprep.mubr.bf16.mxu0 %v2241_v43  ;;  %v2165_v55 = vadd.f32 %v3992_v62, %v1897_v5  ;;  %v1790_v39 = vadd.f32 %v1789_v35, %v3944_v15  ;;  %v2211_v48 = vmax.f32 %v2163_v0, 0.0 }
 0x216   :  { %v1791_v60 = vpop.f32.mrf.mxu0  ;;  %v1904_v27 = vpop.f32.mrf.mxu1  ;;  %2516 = vmatmul.mubr.bf16.gmra.mxu0 %v2240_v42 }
 0x217   :  { %v2166_v26 = vadd.f32 %v3986_v37, %v1899_v54  ;;  %v1792_v53 = vadd.f32 %v1791_v60, %v3948_v16  ;;  %v2213_v4 = vmax.f32 %v2165_v55, 0.0  ;;  %v1903_v51 = vadd.f32 %v1902_v10, %v1790_v39 }
 0x218   :  { %v1793_v63 = vpop.f32.mrf.mxu0  ;;  %v1906_v7 = vpop.f32.mrf.mxu1 }
 0x219   :  { %v2214_v40 = vmax.f32 %v2166_v26, 0.0  ;;  %v1905_v41 = vadd.f32 %v1904_v27, %v1792_v53  ;;  %v1794_v47 = vadd.f32 %v1793_v63, %v3952_v59  ;;  %v2243_v16 = vpack.c.bf16 %v2213_v4, %v2210_v20 }
 0x21a   :  { %v1795_v12 = vpop.f32.mrf.mxu0  ;;  %v1908_v2 = vpop.f32.mrf.mxu1  ;;  %v2168_v57 = vadd.f32 %v3992_v62, %v1903_v51 }
 0x21b   :  { %v1907_v50 = vadd.f32 %v1906_v7, %v1794_v47  ;;  %v1796_v56 = vadd.f32 %v1795_v12, %v3956_v14  ;;  %v2244_v30 = vpack.c.bf16 %v2214_v40, %v2211_v48  ;;  %v2169_v18 = vadd.f32 %v3986_v37, %v1905_v41 }
 0x21c   :  { %v1799_v13 = vpop.f32.mrf.mxu0  ;;  %v1912_v15 = vpop.f32.mrf.mxu1  ;;  %v2216_v43 = vmax.f32 %v2168_v57, 0.0  ;;  %v4135_v47 = vsub.s32 2, %v3665_v6 }
 0x21d   :  { %v2171_v19 = vadd.f32 %v3992_v62, %v1907_v50  ;;  %v1909_v61 = vadd.f32 %v1908_v2, %v1796_v56  ;;  %2523 = vmatprep.mubr.bf16.mxu0 %v2244_v30  ;;  %v1800_v3 = vadd.f32 %v1799_v13, %v3960_v1  ;;  %v2217_v25 = vmax.f32 %v2169_v18, 0.0 }
 0x21e   :  { %v1801_v33 = vpop.f32.mrf.mxu0  ;;  %v1914_v59 = vpop.f32.mrf.mxu1  ;;  %2524 = vmatmul.mubr.bf16.gmra.mxu0 %v2243_v16  ;;  %v4059_v48 = vrot.slane %v3980_v38, %v4135_v47 }
 0x21f   :  { %v2172_v28 = vadd.f32 %v3986_v37, %v1909_v61  ;;  %v1802_v14 = vadd.f32 %v1801_v33, %v3964_v44  ;;  %v2219_v11 = vmax.f32 %v2171_v19, 0.0  ;;  %v1913_v5 = vadd.f32 %v1912_v15, %v1800_v3 }
 0x220   :  { %v1803_v24 = vpop.f32.mrf.mxu0  ;;  %v1916_v52 = vpop.f32.mrf.mxu1 }
 0x221   :  { %v2220_v46 = vmax.f32 %v2172_v28, 0.0  ;;  %v1915_v9 = vadd.f32 %v1914_v59, %v1802_v14  ;;  %v1804_v23 = vadd.f32 %v1803_v24, %v3968_v22  ;;  %v2246_v0 = vpack.c.bf16 %v2219_v11, %v2216_v43 }
 0x222   :  { %v1805_v31 = vpop.f32.mrf.mxu0  ;;  %v1918_v29 = vpop.f32.mrf.mxu1  ;;  %v2174_v22 = vadd.f32 %v3992_v62, %v1913_v5 }
 0x223   :  { %v1806_v35 = vadd.f32 %v1805_v31, %v3972_v8  ;;  %v2247_v10 = vpack.c.bf16 %v2220_v46, %v2217_v25  ;;  %v2175_v1 = vadd.f32 %v3986_v37, %v1915_v9  ;;  %v1917_v42 = vadd.f32 %v1916_v52, %v1804_v23 }
 0x224   :  { %v2902_v44 = vpop.f32.mrf.mxu0  ;;  %v2966_v54 = vpop.f32.mrf.mxu1 }
 0x225   :  { %v1919_v55 = vadd.f32 %v1918_v29, %v1806_v35  ;;  %2531 = vmatprep.mubr.bf16.mxu0 %v2247_v10  ;;  %v2177_v60 = vadd.f32 %v3992_v62, %v1917_v42  ;;  %v2223_v8 = vmax.f32 %v2175_v1, 0.0  ;;  %v2222_v62 = vmax.f32 %v2174_v22, 0.0 }
 0x226   :  { %v2903_v27 = vpop.f32.mrf.mxu0  ;;  %v2967_v49 = vpop.f32.mrf.mxu1  ;;  %2532 = vmatmul.mubr.bf16.gmra.mxu0 %v2246_v0 }
 0x227   :  { %v2178_v26 = vadd.f32 %v3986_v37, %v1919_v55  ;;  %v2904_v39 = vadd.f32 %v2903_v27, %v2902_v44  ;;  %v2225_v7 = vmax.f32 %v2177_v60, 0.0  ;;  %v2968_v41 = vadd.f32 %v2967_v49, %v2966_v54 }
 0x228   :  { %v2905_v53 = vpop.f32.mrf.mxu0  ;;  %v2969_v63 = vpop.f32.mrf.mxu1 }
 0x229   :  { %v2226_v4 = vmax.f32 %v2178_v26, 0.0  ;;  %v1956_v40 = vadd.f32 %v2904_v39, %v3918_v21  ;;  %v2249_v13 = vpack.c.bf16 %v2225_v7, %v2222_v62 }
 0x22a   :  { %v2906_v12 = vpop.f32.mrf.mxu0  ;;  %v2970_v2 = vpop.f32.mrf.mxu1 }
 0x22b   :  { %v2053_v20 = vadd.f32 %v2968_v41, %v1956_v40  ;;  %v2907_v37 = vadd.f32 %v2906_v12, %v2905_v53  ;;  %v2250_v51 = vpack.c.bf16 %v2226_v4, %v2223_v8  ;;  %v2971_v30 = vadd.f32 %v2970_v2, %v2969_v63 }
 0x22c   :  { %v2908_v50 = vpop.f32.mrf.mxu0  ;;  %v2972_v56 = vpop.f32.mrf.mxu1 }
 0x22d   :  { %v1959_v15 = vadd.f32 %v2907_v37, %v3926_v34  ;;  %2539 = vmatprep.mubr.bf16.mxu0 %v2250_v51  ;;  %v2134_v6 = vadd.f32 %v4059_v48, %v2053_v20 }
 0x22e   :  { %v2909_v21 = vpop.f32.mrf.mxu0  ;;  %v2973_v16 = vpop.f32.mrf.mxu1  ;;  %2540 = vmatmul.mubr.bf16.gmra.mxu0 %v2249_v13 }
 0x22f   :  { %v2056_v18 = vadd.f32 %v2971_v30, %v1959_v15  ;;  %v2910_v38 = vadd.f32 %v2909_v21, %v2908_v50  ;;  %v2974_v57 = vadd.f32 %v2973_v16, %v2972_v56  ;;  %v2182_v14 = vmax.f32 %v2134_v6, 0.0  ;;  %v4136_v15 = vld [vmem:[#allocation12_spill] sm:$0xff] }
 0x230   :  { %v2911_v19 = vpop.f32.mrf.mxu0  ;;  %v2975_v61 = vpop.f32.mrf.mxu1 }
 0x231   :  { %v2137_v33 = vadd.f32 %v4059_v48, %v2056_v18  ;;  %v1964_v59 = vadd.f32 %v3914_v17, %v2910_v38 }
 0x232   :  { %v2912_v28 = vpop.f32.mrf.mxu0  ;;  %v2976_v3 = vpop.f32.mrf.mxu1 }
 0x233   :  { %v2185_v34 = vmax.f32 %v2137_v33, 0.0  ;;  %v2061_v24 = vadd.f32 %v2974_v57, %v1964_v59  ;;  %v2913_v52 = vadd.f32 %v2912_v28, %v2911_v19  ;;  %v2977_v9 = vadd.f32 %v2976_v3, %v2975_v61  ;;  %v4137_v57 = vld [vmem:[#allocation14_spill] sm:$0xff] }
 0x234   :  { %v2914_v25 = vpop.f32.mrf.mxu0  ;;  %v2978_v11 = vpop.f32.mrf.mxu1 }
 0x235   :  { %v1967_v46 = vadd.f32 %v3922_v32, %v2913_v52  ;;  %v2230_v23 = vpack.c.bf16 %v2185_v34, %v2182_v14  ;;  %v2140_v43 = vadd.f32 %v4059_v48, %v2061_v24 }
 0x236   :  { %v2915_v31 = vpop.f32.mrf.mxu0  ;;  %v2979_v29 = vpop.f32.mrf.mxu1 }
 0x237   :  { %v2064_v5 = vadd.f32 %v2977_v9, %v1967_v46  ;;  %v2916_v35 = vadd.f32 %v2915_v31, %v2914_v25  ;;  %3142 = vmatprep.mubr.bf16.mxu1 %v2230_v23  ;;  %v2980_v44 = vadd.f32 %v2979_v29, %v2978_v11  ;;  %v2188_v55 = vmax.f32 %v2140_v43, 0.0  ;;  %v4138_v31 = vld [vmem:[#allocation16_spill] sm:$0xff] }
 0x238   :  { %v2917_v17 = vpop.f32.mrf.mxu0  ;;  %v2981_v10 = vpop.f32.mrf.mxu1 }
 0x239   :  { %v2143_v1 = vadd.f32 %v4059_v48, %v2064_v5  ;;  %v1972_v42 = vadd.f32 %v2916_v35, %v3934_v45 }
 0x23a   :  { %v2918_v54 = vpop.f32.mrf.mxu0  ;;  %v2982_v0 = vpop.f32.mrf.mxu1 }
 0x23b   :  { %v2191_v32 = vmax.f32 %v2143_v1, 0.0  ;;  %v2069_v60 = vadd.f32 %v2980_v44, %v1972_v42  ;;  %v2919_v27 = vadd.f32 %v2918_v54, %v2917_v17  ;;  %v2983_v8 = vadd.f32 %v2982_v0, %v2981_v10  ;;  %v4139_v0 = vld [vmem:[#allocation13_spill] sm:$0xff] }
 0x23c   :  { %v2920_v49 = vpop.f32.mrf.mxu0  ;;  %v2984_v22 = vpop.f32.mrf.mxu1 }
 0x23d   :  { %v2233_v26 = vpack.c.bf16 %v2191_v32, %v2188_v55  ;;  %v1975_v39 = vadd.f32 %v2919_v27, %v3942_v58  ;;  %v2146_v7 = vadd.f32 %v4059_v48, %v2069_v60 }
 0x23e   :  { %v2921_v53 = vpop.f32.mrf.mxu0  ;;  %v2985_v63 = vpop.f32.mrf.mxu1 }
 0x23f   :  { %v2072_v4 = vadd.f32 %v2983_v8, %v1975_v39  ;;  %v2922_v40 = vadd.f32 %v2921_v53, %v2920_v49  ;;  %3143 = vmatmul.mubr.bf16.vlgmr.msra.gmra.mxu1 %v2233_v26  ;;  %v2986_v2 = vadd.f32 %v2985_v63, %v2984_v22  ;;  %v2194_v37 = vmax.f32 %v2146_v7, 0.0  ;;  %v4140_v63 = vld [vmem:[#allocation15_spill] sm:$0xff] }
 0x240   :  { %v2923_v45 = vpop.f32.mrf.mxu0  ;;  %v2987_v41 = vpop.f32.mrf.mxu1 }
 0x241   :  { %v2149_v47 = vadd.f32 %v4059_v48, %v2072_v4  ;;  %v1980_v12 = vadd.f32 %v3930_v36, %v2922_v40 }
 0x242   :  { %v2924_v62 = vpop.f32.mrf.mxu0  ;;  %v2988_v20 = vpop.f32.mrf.mxu1 }
 0x243   :  { %v2197_v51 = vmax.f32 %v2149_v47, 0.0  ;;  %v2077_v58 = vadd.f32 %v2986_v2, %v1980_v12  ;;  %v2925_v50 = vadd.f32 %v2924_v62, %v2923_v45  ;;  %v2989_v21 = vadd.f32 %v2988_v20, %v2987_v41 }
 0x244   :  { %v2926_v56 = vpop.f32.mrf.mxu0  ;;  %v2990_v13 = vpop.f32.mrf.mxu1 }
 0x245   :  { %v1983_v30 = vadd.f32 %v4136_v15, %v2925_v50  ;;  %v2236_v16 = vpack.c.bf16 %v2197_v51, %v2194_v37  ;;  %v2152_v38 = vadd.f32 %v4059_v48, %v2077_v58  ;;  %v4141_v51 = vld [vmem:[#allocation18_spill] sm:$0xff] }
 0x246   :  { %v2927_v6 = vpop.f32.mrf.mxu0  ;;  %v2991_v18 = vpop.f32.mrf.mxu1 }
 0x247   :  { %v2080_v19 = vadd.f32 %v2989_v21, %v1983_v30  ;;  %v2928_v61 = vadd.f32 %v2927_v6, %v2926_v56  ;;  %3146 = vmatprep.mubr.bf16.mxu1 %v2236_v16  ;;  %v2992_v3 = vadd.f32 %v2991_v18, %v2990_v13  ;;  %v2200_v24 = vmax.f32 %v2152_v38, 0.0 }
 0x248   :  { %v2929_v36 = vpop.f32.mrf.mxu0  ;;  %v2993_v33 = vpop.f32.mrf.mxu1 }
 0x249   :  { %v2155_v59 = vadd.f32 %v4059_v48, %v2080_v19  ;;  %v1988_v28 = vadd.f32 %v2928_v61, %v4137_v57  ;;  %v4142_v19 = vld [vmem:[#allocation20_spill] sm:$0xff] }
 0x24a   :  { %v2930_v14 = vpop.f32.mrf.mxu0  ;;  %v2994_v34 = vpop.f32.mrf.mxu1 }
 0x24b   :  { %v2203_v52 = vmax.f32 %v2155_v59, 0.0  ;;  %v2085_v25 = vadd.f32 %v2992_v3, %v1988_v28  ;;  %v2931_v11 = vadd.f32 %v2930_v14, %v2929_v36  ;;  %v2995_v43 = vadd.f32 %v2994_v34, %v2993_v33 }
 0x24c   :  { %v2932_v46 = vpop.f32.mrf.mxu0  ;;  %v2996_v9 = vpop.f32.mrf.mxu1 }
 0x24d   :  { %v2239_v23 = vpack.c.bf16 %v2203_v52, %v2200_v24  ;;  %v1991_v29 = vadd.f32 %v2931_v11, %v4138_v31  ;;  %v2158_v17 = vadd.f32 %v4059_v48, %v2085_v25  ;;  %v4143_v52 = vld [vmem:[#allocation17_spill] sm:$0xff] }
 0x24e   :  { %v2933_v5 = vpop.f32.mrf.mxu0  ;;  %v2997_v35 = vpop.f32.mrf.mxu1 }
 0x24f   :  { %v2088_v10 = vadd.f32 %v2995_v43, %v1991_v29  ;;  %v2934_v1 = vadd.f32 %v2933_v5, %v2932_v46  ;;  %3147 = vmatmul.mubr.bf16.gmra.mxu1 %v2239_v23  ;;  %v2998_v32 = vadd.f32 %v2997_v35, %v2996_v9  ;;  %v2206_v49 = vmax.f32 %v2158_v17, 0.0  ;;  %v4144_v5 = vld [vmem:[#allocation19_spill] sm:$0xff] }
 0x250   :  { %v2935_v42 = vpop.f32.mrf.mxu0  ;;  %v2999_v44 = vpop.f32.mrf.mxu1 }
 0x251   :  { %v2161_v54 = vadd.f32 %v4059_v48, %v2088_v10  ;;  %v1996_v55 = vadd.f32 %v4139_v0, %v2934_v1 }
 0x252   :  { %v2936_v60 = vpop.f32.mrf.mxu0  ;;  %v3000_v27 = vpop.f32.mrf.mxu1 }
 0x253   :  { %v2209_v22 = vmax.f32 %v2161_v54, 0.0  ;;  %v2093_v26 = vadd.f32 %v2998_v32, %v1996_v55  ;;  %v2937_v39 = vadd.f32 %v2936_v60, %v2935_v42  ;;  %v3001_v4 = vadd.f32 %v3000_v27, %v2999_v44 }
 0x254   :  { %v2938_v8 = vpop.f32.mrf.mxu0  ;;  %v3002_v53 = vpop.f32.mrf.mxu1 }
 0x255   :  { %v1999_v7 = vadd.f32 %v4140_v63, %v2937_v39  ;;  %v2242_v40 = vpack.c.bf16 %v2209_v22, %v2206_v49  ;;  %v2164_v47 = vadd.f32 %v4059_v48, %v2093_v26 }
 0x256   :  { %v2939_v45 = vpop.f32.mrf.mxu0  ;;  %v3003_v41 = vpop.f32.mrf.mxu1 }
 0x257   :  { %v2096_v12 = vadd.f32 %v3001_v4, %v1999_v7  ;;  %v2940_v2 = vadd.f32 %v2939_v45, %v2938_v8  ;;  %3150 = vmatprep.mubr.bf16.mxu1 %v2242_v40  ;;  %v3004_v50 = vadd.f32 %v3003_v41, %v3002_v53  ;;  %v2212_v15 = vmax.f32 %v2164_v47, 0.0 }
 0x258   :  { %v2941_v62 = vpop.f32.mrf.mxu0  ;;  %v3005_v20 = vpop.f32.mrf.mxu1 }
 0x259   :  { %v2167_v37 = vadd.f32 %v4059_v48, %v2096_v12  ;;  %v2004_v58 = vadd.f32 %v2940_v2, %v4141_v51 }
 0x25a   :  { %v2942_v56 = vpop.f32.mrf.mxu0  ;;  %v3006_v13 = vpop.f32.mrf.mxu1 }
 0x25b   :  { %v2215_v30 = vmax.f32 %v2167_v37, 0.0  ;;  %v2101_v21 = vadd.f32 %v3004_v50, %v2004_v58  ;;  %v2943_v16 = vadd.f32 %v2942_v56, %v2941_v62  ;;  %v3007_v36 = vadd.f32 %v3006_v13, %v3005_v20  ;;  %v4095_v62 = vld [vmem:[%s4123_s7] ss:$0 sm:$0xff] }
 0x25c   :  { %v2944_v6 = vpop.f32.mrf.mxu0  ;;  %v3008_v18 = vpop.f32.mrf.mxu1 }
 0x25d   :  { %v2245_v38 = vpack.c.bf16 %v2215_v30, %v2212_v15  ;;  %v2007_v61 = vadd.f32 %v2943_v16, %v4142_v19  ;;  %v2170_v57 = vadd.f32 %v4059_v48, %v2101_v21 }
 0x25e   :  { %v2945_v33 = vpop.f32.mrf.mxu0  ;;  %v3009_v59 = vpop.f32.mrf.mxu1 }
 0x25f   :  { %v2104_v28 = vadd.f32 %v3007_v36, %v2007_v61  ;;  %v2946_v3 = vadd.f32 %v2945_v33, %v2944_v6  ;;  %3151 = vmatmul.mubr.bf16.gmra.mxu1 %v2245_v38  ;;  %v3010_v11 = vadd.f32 %v3009_v59, %v3008_v18  ;;  %v2218_v23 = vmax.f32 %v2170_v57, 0.0 }
 0x260   :  { %v2947_v14 = vpop.f32.mrf.mxu0  ;;  %v3011_v34 = vpop.f32.mrf.mxu1 }
 0x261   :  { %v2173_v24 = vadd.f32 %v4059_v48, %v2104_v28  ;;  %v2012_v25 = vadd.f32 %v4143_v52, %v2946_v3 }
 0x262   :  { %v2948_v46 = vpop.f32.mrf.mxu0  ;;  %v3012_v9 = vpop.f32.mrf.mxu1 }
 0x263   :  { %v2221_v31 = vmax.f32 %v2173_v24, 0.0  ;;  %v2109_v29 = vadd.f32 %v3010_v11, %v2012_v25  ;;  %v2949_v43 = vadd.f32 %v2948_v46, %v2947_v14  ;;  %v3013_v17 = vadd.f32 %v3012_v9, %v3011_v34 }
 0x265   :  { %v2015_v35 = vadd.f32 %v4144_v5, %v2949_v43  ;;  %v2248_v10 = vpack.c.bf16 %v2221_v31, %v2218_v23  ;;  %v2176_v1 = vadd.f32 %v4059_v48, %v2109_v29 }
 0x267   :  { %v2112_v42 = vadd.f32 %v3013_v17, %v2015_v35  ;;  %3154 = vmatprep.mubr.bf16.mxu1 %v2248_v10  ;;  %v2224_v54 = vmax.f32 %v2176_v1, 0.0 }
 0x269   :  { %v2179_v44 = vadd.f32 %v4059_v48, %v2112_v42 }
 0x26b   :  { %v2227_v0 = vmax.f32 %v2179_v44, 0.0 }
 0x26d   :  { %v2251_v55 = vpack.c.bf16 %v2227_v0, %v2224_v54 }
 0x26f   :  { %3155 = vmatmul.mubr.bf16.gmra.mxu1 %v2251_v55 }
 0x2b6   :  { %v3030_v32 = vpop.f32.mrf.mxu0 }
 0x2b8   :  { %v3031_v60 = vpop.f32.mrf.mxu0 }
 0x2b9   :  { %v3032_v12 = vadd.f32 %v3031_v60, %v3030_v32 }
 0x2ba   :  { %v3033_v27 = vpop.f32.mrf.mxu0 }
 0x2bb   :  { %v2486_v51 = vadd.f32 %v3032_v12, %v4095_v62 }
 0x2bc   :  { %v3034_v49 = vpop.f32.mrf.mxu0 }
 0x2bd   :  { %v3035_v37 = vadd.f32 %v3034_v49, %v3033_v27 }
 0x2be   :  { %v3036_v22 = vpop.f32.mrf.mxu0 }
 0x2bf   :  { %v2489_v30 = vadd.f32 %v3035_v37, %v4095_v62 }
 0x2c0   :  { %v3037_v26 = vpop.f32.mrf.mxu0 }
 0x2c1   :  { %v3038_v15 = vadd.f32 %v3037_v26, %v3036_v22 }
 0x2c2   :  { %v3039_v39 = vpop.f32.mrf.mxu0 }
 0x2c3   :  { %v2494_v38 = vadd.f32 %v3038_v15, %v4095_v62 }
 0x2c4   :  { %v3040_v8 = vpop.f32.mrf.mxu0 }
 0x2c5   :  { %v3041_v18 = vadd.f32 %v3040_v8, %v3039_v39 }
 0x2c6   :  { %v3042_v53 = vpop.f32.mrf.mxu0 }
 0x2c7   :  { %v2497_v33 = vadd.f32 %v3041_v18, %v4095_v62 }
 0x2c8   :  { %v3043_v63 = vpop.f32.mrf.mxu0 }
 0x2c9   :  { %v3044_v36 = vadd.f32 %v3043_v63, %v3042_v53 }
 0x2ca   :  { %v3045_v7 = vpop.f32.mrf.mxu0 }
 0x2cb   :  { %v2502_v14 = vadd.f32 %v3044_v36, %v4095_v62 }
 0x2cc   :  { %v3046_v4 = vpop.f32.mrf.mxu0 }
 0x2cd   :  { %v3047_v3 = vadd.f32 %v3046_v4, %v3045_v7 }
 0x2ce   :  { %v3048_v40 = vpop.f32.mrf.mxu0 }
 0x2cf   :  { %v2505_v46 = vadd.f32 %v3047_v3, %v4095_v62 }
 0x2d0   :  { %v3049_v45 = vpop.f32.mrf.mxu0 }
 0x2d1   :  { %v3050_v11 = vadd.f32 %v3049_v45, %v3048_v40 }
 0x2d2   :  { %v3051_v41 = vpop.f32.mrf.mxu0 }
 0x2d3   :  { %v2510_v43 = vadd.f32 %v3050_v11, %v4095_v62 }
 0x2d4   :  { %v3052_v48 = vpop.f32.mrf.mxu0 }
 0x2d5   :  { %v3053_v29 = vadd.f32 %v3052_v48, %v3051_v41 }
 0x2d6   :  { %v3054_v47 = vpop.f32.mrf.mxu0 }
 0x2d7   :  { %v2513_v10 = vadd.f32 %v3053_v29, %v4095_v62 }
 0x2d8   :  { %v3055_v2 = vpop.f32.mrf.mxu0 }
 0x2d9   :  { %v3056_v17 = vadd.f32 %v3055_v2, %v3054_v47 }
 0x2da   :  { %v3057_v58 = vpop.f32.mrf.mxu0 }
 0x2db   :  { %v2518_v0 = vadd.f32 %v3056_v17, %v4095_v62 }
 0x2dc   :  { %v3058_v21 = vpop.f32.mrf.mxu0 }
 0x2dd   :  { %v3059_v54 = vadd.f32 %v3058_v21, %v3057_v58 }
 0x2de   :  { %v3060_v19 = vpop.f32.mrf.mxu0 }
 0x2df   :  { %v2521_v22 = vadd.f32 %v3059_v54, %v4095_v62 }
 0x2e0   :  { %v3061_v59 = vpop.f32.mrf.mxu0 }
 0x2e1   :  { %v3062_v49 = vadd.f32 %v3061_v59, %v3060_v19 }
 0x2e2   :  { %v3063_v34 = vpop.f32.mrf.mxu0 }
 0x2e3   :  { %v2526_v63 = vadd.f32 %v3062_v49, %v4095_v62 }
 0x2e4   :  { %v3064_v9 = vpop.f32.mrf.mxu0 }
 0x2e5   :  { %v3065_v53 = vadd.f32 %v3064_v9, %v3063_v34 }
 0x2e6   :  { %v3066_v5 = vpop.f32.mrf.mxu0 }
 0x2e7   :  { %v2529_v45 = vadd.f32 %v3065_v53, %v4095_v62 }
 0x2e8   :  { %v3067_v1 = vpop.f32.mrf.mxu0 }
 0x2e9   :  { %v3068_v40 = vadd.f32 %v3067_v1, %v3066_v5 }
 0x2ea   :  { %v3069_v55 = vpop.f32.mrf.mxu0 }
 0x2eb   :  { %v2534_v2 = vadd.f32 %v3068_v40, %v4095_v62 }
 0x2ec   :  { %v3070_v26 = vpop.f32.mrf.mxu0 }
 0x2ed   :  { %v3071_v12 = vadd.f32 %v3070_v26, %v3069_v55 }
 0x2ee   :  { %v3072_v7 = vpop.f32.mrf.mxu0 }
 0x2f0   :  { %v3073_v41 = vpop.f32.mrf.mxu0 }
 0x2ff   :  { %v3144_v20 = vpop.f32.mrf.mxu1 }
 0x300   :  { %v2591_v61 = vadd.f32 %v3144_v20, %v2494_v38  ;;  %v3075_v20 = vpop.f32.mrf.mxu0 }
 0x301   :  { %v2582_v50 = vpop.f32.mrf.mxu1 }
 0x302   :  { %v2583_v56 = vadd.f32 %v2582_v50, %v2486_v51  ;;  %v3074_v50 = vadd.f32 %v3073_v41, %v3072_v7 }
 0x303   :  { %v3145_v13 = vpop.f32.mrf.mxu1 }
 0x304   :  { %2645 = vxpose.xlu0.b32.start [1/16] (narrow) %v2583_v56, 8  ;;  %v2594_v57 = vadd.f32 %v3145_v13, %v2497_v33  ;;  %v2537_v56 = vadd.f32 %v3071_v12, %v4095_v62  ;;  %v3076_v13 = vpop.f32.mrf.mxu0 }
 0x305   :  { %v2585_v16 = vpop.f32.mrf.mxu1  ;;  %v3077_v21 = vadd.f32 %v3076_v13, %v3075_v20 }
 0x306   :  { %v2586_v6 = vadd.f32 %v2585_v16, %v2489_v30  ;;  %v2542_v16 = vadd.f32 %v3074_v50, %v4095_v62 }
 0x307   :  { %v2545_v18 = vadd.f32 %v3077_v21, %v4095_v62 }
 0x308   :  { %2646 = vxpose.xlu0.b32.cont [2/16] (narrow) %v2586_v6, 8 }
 0x30c   :  { %2647 = vxpose.xlu0.b32.cont [3/16] (narrow) %v2591_v61, 8 }
 0x30f   :  { %v3148_v28 = vpop.f32.mrf.mxu1 }
 0x310   :  { %2648 = vxpose.xlu0.b32.cont [4/16] (narrow) %v2594_v57, 8  ;;  %v2607_v35 = vadd.f32 %v3148_v28, %v2510_v43 }
 0x311   :  { %v2598_v24 = vpop.f32.mrf.mxu1 }
 0x312   :  { %v2599_v52 = vadd.f32 %v2598_v24, %v2502_v14 }
 0x313   :  { %v3149_v25 = vpop.f32.mrf.mxu1 }
 0x314   :  { %2649 = vxpose.xlu0.b32.cont [5/16] (narrow) %v2599_v52, 8  ;;  %v2610_v42 = vadd.f32 %v3149_v25, %v2513_v10 }
 0x315   :  { %v2601_v23 = vpop.f32.mrf.mxu1 }
 0x316   :  { %v2602_v31 = vadd.f32 %v2601_v23, %v2505_v46 }
 0x318   :  { %2650 = vxpose.xlu0.b32.cont [6/16] (narrow) %v2602_v31, 8 }
 0x31c   :  { %2651 = vxpose.xlu0.b32.cont [7/16] (narrow) %v2607_v35, 8 }
 0x31f   :  { %v3152_v44 = vpop.f32.mrf.mxu1 }
 0x320   :  { %2652 = vxpose.xlu0.b32.cont [8/16] (narrow) %v2610_v42, 8  ;;  %v2623_v4 = vadd.f32 %v3152_v44, %v2526_v63 }
 0x321   :  { %v2614_v32 = vpop.f32.mrf.mxu1 }
 0x322   :  { %v2615_v60 = vadd.f32 %v2614_v32, %v2518_v0 }
 0x323   :  { %v3153_v27 = vpop.f32.mrf.mxu1 }
 0x324   :  { %2653 = vxpose.xlu0.b32.cont [9/16] (narrow) %v2615_v60, 8  ;;  %v2626_v48 = vadd.f32 %v3153_v27, %v2529_v45 }
 0x325   :  { %v2617_v39 = vpop.f32.mrf.mxu1 }
 0x326   :  { %v2618_v8 = vadd.f32 %v2617_v39, %v2521_v22 }
 0x328   :  { %2654 = vxpose.xlu0.b32.cont [10/16] (narrow) %v2618_v8, 8 }
 0x32c   :  { %2655 = vxpose.xlu0.b32.cont [11/16] (narrow) %v2623_v4, 8 }
 0x32f   :  { %v3156_v47 = vpop.f32.mrf.mxu1 }
 0x330   :  { %2656 = vxpose.xlu0.b32.cont [12/16] (narrow) %v2626_v48, 8  ;;  %v2639_v6 = vadd.f32 %v3156_v47, %v2542_v16 }
 0x331   :  { %v2630_v37 = vpop.f32.mrf.mxu1 }
 0x332   :  { %v2631_v51 = vadd.f32 %v2630_v37, %v2534_v2 }
 0x333   :  { %v3157_v58 = vpop.f32.mrf.mxu1 }
 0x334   :  { %2657 = vxpose.xlu0.b32.cont [13/16] (narrow) %v2631_v51, 8  ;;  %v2642_v38 = vadd.f32 %v3157_v58, %v2545_v18 }
 0x335   :  { %v2633_v15 = vpop.f32.mrf.mxu1 }
 0x336   :  { %v2634_v30 = vadd.f32 %v2633_v15, %v2537_v56 }
 0x338   :  { %2658 = vxpose.xlu0.b32.cont [14/16] (narrow) %v2634_v30, 8 }
 0x33c   :  { %2659 = vxpose.xlu0.b32.cont [15/16] (narrow) %v2639_v6, 8 }
 0x340   :  { %2660 = vxpose.xlu0.b32.end [16/16] (narrow) %v2642_v38, 8 }
 0x380   :  { %v2661_v19 = vpop.trf.xlu0 }
 0x381   :  { %2677 = vst [vmem:[%s4124_s8] sm:$0xff] %v2661_v19 }
 0x382   :  { %2682 = vsyncpa [#allocation3], 1 }
 0x383   :  { %2683 = vsyncpa [#allocation5], 1 }
 0x384   :  { %2684 = vsyncpa [#allocation8], 1 }

</bundles_post_ra>
